<compile_context>
chip_gen: v6e
topology: v6e:2x2x1
jax: 0.10.0
libtpu: 0.0.40
codegen_flags: <defaults>
</compile_context>

<pallas_src>
import functools

import jax
import jax.numpy as jnp
from jax import lax
from jax.experimental import pallas as pl
from jax.experimental.pallas import tpu as pltpu

HIDDEN = 64


def _mlp_kernel(x_ref, small_ref, w2_ref, w3_ref, b4_ref, o_ref, *,
                chunk, num_chunks):
    # x_ref : (1, TB) f32        small_ref : (64, 5) f32 = [w1|b1|b2|b3|w4^T]
    # w2_ref/w3_ref : (64, 64) bf16         b4_ref : (1,) f32 in SMEM
    small = small_ref[...]                       # load the tiny block once
    w1  = small[:, 0:1]                          # (64, 1)
    b1  = small[:, 1:2]
    b2  = small[:, 2:3]
    b3  = small[:, 3:4]
    w4c = small[:, 4:5]                          # (64, 1) column of fc4 weight
    b4  = b4_ref[0]                              # scalar
    w2  = w2_ref[...]                            # (64, 64) bf16 (resident)
    w3  = w3_ref[...]

    def body(c, carry):
        off = pl.multiple_of(c * chunk, chunk)
        x = x_ref[:, pl.ds(off, chunk)]                              # (1, chunk) f32

        # fc1: in_features == 1 -> outer-product broadcast on the VPU (f32).
        h = jnp.maximum(w1 * x + b1, 0.0)                            # (64, chunk) f32

        # fc2 / fc3: bf16 operands on the MXU, f32 accumulation + f32 epilogue.
        h = jnp.dot(w2, h.astype(jnp.bfloat16),
                    preferred_element_type=jnp.float32) + b2
        h = jnp.maximum(h, 0.0)                                      # (64, chunk) f32
        h = jnp.dot(w3, h.astype(jnp.bfloat16),
                    preferred_element_type=jnp.float32) + b3
        h = jnp.maximum(h, 0.0)                                      # (64, chunk) f32

        # fc4 (out_features == 1): keep it OFF the MXU — broadcast multiply +
        # cross-sublane reduction on VPU/XLU, then SMEM-scalar bias.
        y = jnp.sum(h * w4c, axis=0, keepdims=True) + b4             # (1, chunk) f32
        o_ref[:, pl.ds(off, chunk)] = y.astype(o_ref.dtype)          # lane-dense store
        return carry

    lax.fori_loop(0, num_chunks, body, 0, unroll=True)


def prepare_params(params):
    """One-time layout prep: consolidate the tiny operands into a single (64, 5)
    f32 block [w1|b1|b2|b3|w4^T], pre-cast the 64x64 MXU weights to bf16, and
    keep b4 as a (1,) f32 scalar (goes to SMEM)."""
    (w1, b1), (w2, b2), (w3, b3), (w4, b4) = params
    small = jnp.concatenate(
        [w1.reshape(HIDDEN, 1),
         b1.reshape(HIDDEN, 1),
         b2.reshape(HIDDEN, 1),
         b3.reshape(HIDDEN, 1),
         w4.reshape(HIDDEN, 1)], axis=1).astype(jnp.float32)        # (64, 5)
    return (small,
            w2.astype(jnp.bfloat16),                                 # (64, 64)
            w3.astype(jnp.bfloat16),                                 # (64, 64)
            b4.reshape(1).astype(jnp.float32))                       # (1,)


def _pick_tb(N, *, max_tb=4096, min_steps=4):
    """Batch tile: a multiple of 128 dividing N, <= max_tb, keeping >= min_steps
    grid steps when possible (v7x megacore sharding + double-buffer overlap)."""
    if N % 128 != 0:
        return N                                  # tiny/ragged batch: one full tile
    n128 = N // 128
    gmax = min(max_tb // 128, n128)
    if n128 >= min_steps:
        gmax = min(gmax, n128 // min_steps)
    gmax = max(gmax, 1)
    for g in range(gmax, 0, -1):
        if n128 % g == 0:
            return 128 * g
    return 128


def _pick_chunk(tb, *, max_chunk=512):
    """Lane-chunk inside a tile: bounds the live (64, chunk) f32 activation to
    <= ~32 vregs so the activation chain does not spill at large TB."""
    if tb <= max_chunk:
        return tb
    for c in range(max_chunk - (max_chunk % 128), 127, -128):
        if tb % c == 0:
            return c
    return tb


def feedforward_nn(x, prepared, *, max_tb=4096, max_chunk=512, min_steps=4):
    """x: (N, 1) float32 -> (N,) float32, matching FeedForwardNN.forward."""
    N, F = x.shape
    assert F == 1
    small, w2, w3, b4 = prepared

    tb = _pick_tb(N, max_tb=max_tb, min_steps=min_steps)
    assert N % tb == 0
    chunk = _pick_chunk(tb, max_chunk=max_chunk)
    assert tb % chunk == 0
    num_chunks = tb // chunk

    # Batch onto the lane axis: (N, 1) -> (1, N) (same element order, pure reshape).
    x_row = x.reshape(1, N)

    kernel = functools.partial(_mlp_kernel, chunk=chunk, num_chunks=num_chunks)
    resident = lambda a: pl.BlockSpec(a.shape, lambda i: (0, 0))     # weights stay put

    cost = pl.CostEstimate(
        flops=2 * N * HIDDEN * (2 * HIDDEN + 2),
        transcendentals=0,
        bytes_accessed=8 * N + 2 * (w2.size + w3.size) + 4 * (small.size + b4.size),
    )

    out_row = pl.pallas_call(
        kernel,
        out_shape=jax.ShapeDtypeStruct((1, N), jnp.float32),
        grid_spec=pl.GridSpec(
            grid=(N // tb,),
            in_specs=[
                pl.BlockSpec((1, tb), lambda i: (0, i)),             # x tile, lane-dense
                resident(small),                                      # (64, 5) f32
                resident(w2),                                         # (64, 64) bf16
                resident(w3),                                         # (64, 64) bf16
                pl.BlockSpec(memory_space=pltpu.MemorySpace.SMEM),    # b4 scalar
            ],
            out_specs=pl.BlockSpec((1, tb), lambda i: (0, i)),        # lane-dense output
        ),
        compiler_params=pltpu.CompilerParams(
            dimension_semantics=("parallel",)),                       # megacore-shardable
        cost_estimate=cost,
    )(x_row, small, w2, w3, b4)

    # torch: x.squeeze(-1)
    return out_row.reshape(N)


def init_params(key):
    """Deterministic synthetic init; shapes match nn.Linear of FeedForwardNN."""
    ks = jax.random.split(key, 8)

    def lin(kw, kb, out_f, in_f):
        scale = 1.0 / jnp.sqrt(in_f)
        w = jax.random.uniform(kw, (out_f, in_f), jnp.float32, -scale, scale)
        b = jax.random.uniform(kb, (out_f,), jnp.float32, -scale, scale)
        return w, b

    return (
        lin(ks[0], ks[1], HIDDEN, 1),       # fc1: 1  -> 64
        lin(ks[2], ks[3], HIDDEN, HIDDEN),  # fc2: 64 -> 64
        lin(ks[4], ks[5], HIDDEN, HIDDEN),  # fc3: 64 -> 64
        lin(ks[6], ks[7], 1, HIDDEN),       # fc4: 64 -> 1
    )


def _reference(x, params):
    """Pure-JAX reference mirroring the kernel's numerics: bf16 matmul operands
    for fc2/fc3 (f32 accumulation), full-f32 elementwise fc1/fc4."""
    (w1, b1), (w2, b2), (w3, b3), (w4, b4) = params
    bf = lambda a: a.astype(jnp.bfloat16).astype(jnp.float32)
    h = jax.nn.relu(x * w1[:, 0][None, :] + b1[None, :])             # fc1 (K=1)
    h = jax.nn.relu(jnp.dot(bf(h), bf(w2.T),
                            precision=lax.Precision.HIGHEST) + b2)   # fc2
    h = jax.nn.relu(jnp.dot(bf(h), bf(w3.T),
                            precision=lax.Precision.HIGHEST) + b3)   # fc3
    y = jnp.sum(h * w4[0][None, :], axis=-1) + b4[0]                 # fc4 (M=1)
    return y


if __name__ == "__main__":
    key = jax.random.PRNGKey(0)
    k_param, k_x = jax.random.split(key)

    params = init_params(k_param)
    prepared = prepare_params(params)

    # N=4096 keeps the problem small while exercising 4 grid steps (v7x megacore
    # + pipelining) at tb=1024 and 2 lane-chunks of 512 inside each tile.
    N = 4096
    x = jax.random.normal(k_x, (N, 1), jnp.float32)

    out = jax.block_until_ready(feedforward_nn(x, prepared))

    ref = _reference(x, params)
    assert out.shape == (N,)
    max_err = float(jnp.max(jnp.abs(out - ref)))
    assert jnp.allclose(out, ref, atol=1e-3, rtol=1e-3), \
        f"mismatch vs reference (max abs err {max_err})"

    print("KERNEL_OK")
</pallas_src>

<mosaic_0001>
module attributes {stable_mosaic.version = 11 : i64} {
  func.func @_mlp_kernel(%arg0: i32, %arg1: memref<1x1024xf32, #tpu.memory_space<vmem>>, %arg2: memref<64x5xf32, #tpu.memory_space<vmem>>, %arg3: memref<64x64xbf16, #tpu.memory_space<vmem>>, %arg4: memref<64x64xbf16, #tpu.memory_space<vmem>>, %arg5: memref<1xf32, #tpu.memory_space<smem>>, %arg6: memref<1x1024xf32, #tpu.memory_space<vmem>>) attributes {dimension_semantics = [#tpu.dimension_semantics<parallel>], iteration_bounds = array<i64: 4>, scalar_prefetch = 0 : i64, scratch_operands = 0 : i64, tpu.core_type = #tpu.core_type<tc>, window_params = [{transform_indices = @transform_0, window_bounds = array<i64: 1, 1024>}, {pipeline_mode = #tpu.pipeline_mode<synchronous>, transform_indices = @transform_1, window_bounds = array<i64: 64, 5>}, {pipeline_mode = #tpu.pipeline_mode<synchronous>, transform_indices = @transform_2, window_bounds = array<i64: 64, 64>}, {pipeline_mode = #tpu.pipeline_mode<synchronous>, transform_indices = @transform_3, window_bounds = array<i64: 64, 64>}, {transform_indices = @transform_4, window_bounds = array<i64: 1>}, {transform_indices = @transform_5, window_bounds = array<i64: 1, 1024>}]} {
    %c0 = arith.constant 0 : index
    %c0_0 = arith.constant 0 : index
    %0 = vector.load %arg2[%c0, %c0_0] : memref<64x5xf32, #tpu.memory_space<vmem>>, vector<64x5xf32>
    %1 = vector.extract_strided_slice %0 {offsets = [0, 0], sizes = [64, 1], strides = [1, 1]} : vector<64x5xf32> to vector<64x1xf32>
    %2 = vector.extract_strided_slice %0 {offsets = [0, 1], sizes = [64, 1], strides = [1, 1]} : vector<64x5xf32> to vector<64x1xf32>
    %3 = vector.extract_strided_slice %0 {offsets = [0, 2], sizes = [64, 1], strides = [1, 1]} : vector<64x5xf32> to vector<64x1xf32>
    %4 = vector.extract_strided_slice %0 {offsets = [0, 3], sizes = [64, 1], strides = [1, 1]} : vector<64x5xf32> to vector<64x1xf32>
    %5 = vector.extract_strided_slice %0 {offsets = [0, 4], sizes = [64, 1], strides = [1, 1]} : vector<64x5xf32> to vector<64x1xf32>
    %c0_1 = arith.constant 0 : index
    %6 = memref.load %arg5[%c0_1] : memref<1xf32, #tpu.memory_space<smem>>
    %c0_2 = arith.constant 0 : index
    %c0_3 = arith.constant 0 : index
    %7 = vector.load %arg3[%c0_2, %c0_3] : memref<64x64xbf16, #tpu.memory_space<vmem>>, vector<64x64xbf16>
    %c0_4 = arith.constant 0 : index
    %c0_5 = arith.constant 0 : index
    %8 = vector.load %arg4[%c0_4, %c0_5] : memref<64x64xbf16, #tpu.memory_space<vmem>>, vector<64x64xbf16>
    %c0_i32 = arith.constant 0 : i32
    %c512_i32 = arith.constant 512 : i32
    %9 = arith.muli %c0_i32, %c512_i32 : i32
    %10 = tpu.assume_multiple %9, 512 : i32
    %c0_6 = arith.constant 0 : index
    %11 = arith.index_cast %10 : i32 to index
    %12 = vector.load %arg1[%c0_6, %11] : memref<1x1024xf32, #tpu.memory_space<vmem>>, vector<1x512xf32>
    %13 = vector.broadcast %1 : vector<64x1xf32> to vector<64x512xf32>
    %14 = vector.broadcast %12 : vector<1x512xf32> to vector<64x512xf32>
    %15 = arith.mulf %13, %14 : vector<64x512xf32>
    %16 = vector.broadcast %2 : vector<64x1xf32> to vector<64x512xf32>
    %17 = arith.addf %15, %16 : vector<64x512xf32>
    %cst = arith.constant 0.000000e+00 : f32
    %18 = vector.broadcast %cst : f32 to vector<64x512xf32>
    %19 = arith.maximumf %17, %18 : vector<64x512xf32>
    %20 = arith.truncf %19 : vector<64x512xf32> to vector<64x512xbf16>
    %cst_7 = arith.constant dense<0.000000e+00> : vector<64x512xf32>
    %21 = tpu.matmul %7, %20, %cst_7 {dimension_numbers = #tpu.dot_dimension_numbers<[1], [0], [0], [1], [0, 0, 1, 1], [], []>} : vector<64x64xbf16>, vector<64x512xbf16>, vector<64x512xf32> -> vector<64x512xf32>
    %22 = vector.broadcast %3 : vector<64x1xf32> to vector<64x512xf32>
    %23 = arith.addf %21, %22 : vector<64x512xf32>
    %cst_8 = arith.constant 0.000000e+00 : f32
    %24 = vector.broadcast %cst_8 : f32 to vector<64x512xf32>
    %25 = arith.maximumf %23, %24 : vector<64x512xf32>
    %26 = arith.truncf %25 : vector<64x512xf32> to vector<64x512xbf16>
    %cst_9 = arith.constant dense<0.000000e+00> : vector<64x512xf32>
    %27 = tpu.matmul %8, %26, %cst_9 {dimension_numbers = #tpu.dot_dimension_numbers<[1], [0], [0], [1], [0, 0, 1, 1], [], []>} : vector<64x64xbf16>, vector<64x512xbf16>, vector<64x512xf32> -> vector<64x512xf32>
    %28 = vector.broadcast %4 : vector<64x1xf32> to vector<64x512xf32>
    %29 = arith.addf %27, %28 : vector<64x512xf32>
    %cst_10 = arith.constant 0.000000e+00 : f32
    %30 = vector.broadcast %cst_10 : f32 to vector<64x512xf32>
    %31 = arith.maximumf %29, %30 : vector<64x512xf32>
    %32 = vector.broadcast %5 : vector<64x1xf32> to vector<64x512xf32>
    %33 = arith.mulf %31, %32 : vector<64x512xf32>
    %cst_11 = arith.constant dense<0.000000e+00> : vector<512xf32>
    %34 = vector.multi_reduction <add>, %33, %cst_11 [0] : vector<64x512xf32> to vector<512xf32>
    %35 = vector.shape_cast %34 : vector<512xf32> to vector<1x512xf32>
    %36 = vector.broadcast %6 : f32 to vector<1x512xf32>
    %37 = arith.addf %35, %36 : vector<1x512xf32>
    %c0_12 = arith.constant 0 : index
    %38 = arith.index_cast %10 : i32 to index
    %39 = vector.load %arg6[%c0_12, %38] : memref<1x1024xf32, #tpu.memory_space<vmem>>, vector<1x512xf32>
    tpu.vector_store %arg6[%c0_12, %38], %37 {strides = array<i32>} : memref<1x1024xf32, #tpu.memory_space<vmem>>, vector<1x512xf32>,
    %c1_i32 = arith.constant 1 : i32
    %c512_i32_13 = arith.constant 512 : i32
    %40 = arith.muli %c1_i32, %c512_i32_13 : i32
    %41 = tpu.assume_multiple %40, 512 : i32
    %c0_14 = arith.constant 0 : index
    %42 = arith.index_cast %41 : i32 to index
    %43 = vector.load %arg1[%c0_14, %42] : memref<1x1024xf32, #tpu.memory_space<vmem>>, vector<1x512xf32>
    %44 = vector.broadcast %1 : vector<64x1xf32> to vector<64x512xf32>
    %45 = vector.broadcast %43 : vector<1x512xf32> to vector<64x512xf32>
    %46 = arith.mulf %44, %45 : vector<64x512xf32>
    %47 = vector.broadcast %2 : vector<64x1xf32> to vector<64x512xf32>
    %48 = arith.addf %46, %47 : vector<64x512xf32>
    %cst_15 = arith.constant 0.000000e+00 : f32
    %49 = vector.broadcast %cst_15 : f32 to vector<64x512xf32>
    %50 = arith.maximumf %48, %49 : vector<64x512xf32>
    %51 = arith.truncf %50 : vector<64x512xf32> to vector<64x512xbf16>
    %cst_16 = arith.constant dense<0.000000e+00> : vector<64x512xf32>
    %52 = tpu.matmul %7, %51, %cst_16 {dimension_numbers = #tpu.dot_dimension_numbers<[1], [0], [0], [1], [0, 0, 1, 1], [], []>} : vector<64x64xbf16>, vector<64x512xbf16>, vector<64x512xf32> -> vector<64x512xf32>
    %53 = vector.broadcast %3 : vector<64x1xf32> to vector<64x512xf32>
    %54 = arith.addf %52, %53 : vector<64x512xf32>
    %cst_17 = arith.constant 0.000000e+00 : f32
    %55 = vector.broadcast %cst_17 : f32 to vector<64x512xf32>
    %56 = arith.maximumf %54, %55 : vector<64x512xf32>
    %57 = arith.truncf %56 : vector<64x512xf32> to vector<64x512xbf16>
    %cst_18 = arith.constant dense<0.000000e+00> : vector<64x512xf32>
    %58 = tpu.matmul %8, %57, %cst_18 {dimension_numbers = #tpu.dot_dimension_numbers<[1], [0], [0], [1], [0, 0, 1, 1], [], []>} : vector<64x64xbf16>, vector<64x512xbf16>, vector<64x512xf32> -> vector<64x512xf32>
    %59 = vector.broadcast %4 : vector<64x1xf32> to vector<64x512xf32>
    %60 = arith.addf %58, %59 : vector<64x512xf32>
    %cst_19 = arith.constant 0.000000e+00 : f32
    %61 = vector.broadcast %cst_19 : f32 to vector<64x512xf32>
    %62 = arith.maximumf %60, %61 : vector<64x512xf32>
    %63 = vector.broadcast %5 : vector<64x1xf32> to vector<64x512xf32>
    %64 = arith.mulf %62, %63 : vector<64x512xf32>
    %cst_20 = arith.constant dense<0.000000e+00> : vector<512xf32>
    %65 = vector.multi_reduction <add>, %64, %cst_20 [0] : vector<64x512xf32> to vector<512xf32>
    %66 = vector.shape_cast %65 : vector<512xf32> to vector<1x512xf32>
    %67 = vector.broadcast %6 : f32 to vector<1x512xf32>
    %68 = arith.addf %66, %67 : vector<1x512xf32>
    %c0_21 = arith.constant 0 : index
    %69 = arith.index_cast %41 : i32 to index
    %70 = vector.load %arg6[%c0_21, %69] : memref<1x1024xf32, #tpu.memory_space<vmem>>, vector<1x512xf32>
    tpu.vector_store %arg6[%c0_21, %69], %68 {strides = array<i32>} : memref<1x1024xf32, #tpu.memory_space<vmem>>, vector<1x512xf32>,
    %c2_i32 = arith.constant 2 : i32
    return
  }
  func.func @transform_0(%arg0: i32) -> (i32, i32) {
    %c0_i32 = arith.constant 0 : i32
    %c0_i32_0 = arith.constant 0 : i32
    return %c0_i32, %arg0 : i32, i32
  }
  func.func @transform_1(%arg0: i32) -> (i32, i32) {
    %c0_i32 = arith.constant 0 : i32
    %c0_i32_0 = arith.constant 0 : i32
    %c0_i32_1 = arith.constant 0 : i32
    return %c0_i32, %c0_i32_0 : i32, i32
  }
  func.func @transform_2(%arg0: i32) -> (i32, i32) {
    %c0_i32 = arith.constant 0 : i32
    %c0_i32_0 = arith.constant 0 : i32
    %c0_i32_1 = arith.constant 0 : i32
    return %c0_i32, %c0_i32_0 : i32, i32
  }
  func.func @transform_3(%arg0: i32) -> (i32, i32) {
    %c0_i32 = arith.constant 0 : i32
    %c0_i32_0 = arith.constant 0 : i32
    %c0_i32_1 = arith.constant 0 : i32
    return %c0_i32, %c0_i32_0 : i32, i32
  }
  func.func @transform_4(%arg0: i32) -> i32 {
    %c0_i32 = arith.constant 0 : i32
    %c0_i32_0 = arith.constant 0 : i32
    return %c0_i32 : i32
  }
  func.func @transform_5(%arg0: i32) -> (i32, i32) {
    %c0_i32 = arith.constant 0 : i32
    %c0_i32_0 = arith.constant 0 : i32
    return %c0_i32, %arg0 : i32, i32
  }
}

</mosaic_0001>

<bundles_post_ra>
// kernel: tpu_custom_call.1
= control target key start
LH: loop header
LB: loop body
LE: loop exit
PB: predicated region body
PF: predicated region fallthrough
CT: control target
= control target key end

     0   :  { %s3110_s0 = inlined_call_operand.vmem [shape: f32[1,4096], index: 0, kind: input, shape index: {}]   ;;  %s3111_s1 = inlined_call_operand.vmem [shape: f32[64,5], index: 1, kind: input, shape index: {}]   ;;  %s3112_s2 = inlined_call_operand.vmem [shape: bf16[64,64], index: 2, kind: input, shape index: {}]   ;;  %s3113_s3 = inlined_call_operand.hbm [shape: bf16[64,64], index: 3, kind: input, shape index: {}]   ;;  %s3114_s4 = inlined_call_operand.<no memory space> [shape: f32[1], index: 4, kind: input, shape index: {}]   ;;  %s3115_s5 = inlined_call_operand.hbm [shape: f32[1,4096], index: 5, kind: output, shape index: {}]  }
   0x1   :  { %10 = sst [smem:[#allocation2]] %s3114_s4 }
   0x2   :  { %11 = vsyncpa [#allocation4], 0 }
   0x3   :  { %12 = vsyncpa [#allocation5], 0 }
   0x4   :  { %14 = vsyncpa [#allocation5 + $0x1], 0  ;;  %s2115_s20 = smov 0   ;;  %s2117_s21 = smov 0  }
   0x5   :  { %s2119_s22 = smov 0   ;;  %s2121_s23 = smov 0  }
   0x6 LB: > { %s2136_s4 = sadd.s32 4294967295, %s2070_s23   ;;  %s1836_s24 = sadd.s32 4294967294, %s2070_s23   ;;  %s2070_s23 = sphi %s2121_s23, %s3237_s23   ;;  %s2066_s22 = sphi %s2119_s22, %s3236_s22   ;;  %s2062_s21 = sphi %s2117_s21, %s3235_s21   ;;  %s2058_s20 = sphi %s2115_s20, %s3234_s20  }
   0x7   : > { %s2140_s25 = sadd.s32 1, %s2070_s23   ;;  %s137_s26 = sadd.s32 1, %s2066_s22 }
   0x8   : > { %s134_s27 = ssub.s32 %s2070_s23, %s2140_s25  ;;  %p147_p0 = scmp.ne.s32.totalorder %s2066_s22, %s2062_s21 }
   0x9   : > { %p135_p1 = scmp.eq.s32.totalorder %s134_s27, 0  ;;  %p148_p2 = scmp.eq.s32.totalorder %s2136_s4, 3 }
   0xa   : > { %p153_p3 = scmp.ne.s32.totalorder %s2062_s21, %s2058_s20  ;;  %p154_p4 = scmp.eq.s32.totalorder %s1836_s24, 3 }
   0xb   : > { %s2151_s28 = scalar_select %p135_p1, %s2066_s22, %s137_s26  }
   0xc   : > { %p2153_p5 = por %p148_p2, %p147_p0  ;;  %p2157_p6 = por %p154_p4, %p153_p3 }
   0xd   : > { %p1837_p7 = scmp.ge.s32.totalorder %s2070_s23, 1  ;;  %p161_p8 = scmp.lt.s32.totalorder %s2070_s23, 5 }
   0xe   : > { %s3165_s30 = scalar_select %p2157_p6, 1, 0 }
   0xf   : > { %p1906_p9 = scmp.eq.s32.totalorder %s2136_s4, 0  ;;  %p2164_p10 = pnand %p1837_p7, %p161_p8 }
  0x10   : > { %s2072_s7 = smov [#allocation3]  }
  0x11   : > { %s179_s8 = sshll.u32 %s2072_s7, 4  ;;  %p1898_p11 = pneg %p2164_p10  ;;  %s180_s8 = int_to_ptr.vmem [resolvable:$true] %s179_s8 }
  0x12   : > { %s1991_s9 = scalar_lea.vmem %s180_s8, 512  ;;  %p1999_p3 = scmp.lt.s32.totalorder %s180_s8, %s180_s8 }
  0x13   : > { %p1899_p12 = pnand %p1906_p9, %p1898_p11  ;;  %p1992_p0 = scmp.ne.s32.totalorder %s180_s8, %s1991_s9 }
  0x14   : > { %p2000_p4 = scmp.lt.s32.totalorder %s1991_s9, %s1991_s9 }
  0x15   : > { %p1982_p13 = pneg %p1899_p12 }
  0x16   : > { %p2001_p6 = por %p2000_p4, %p1999_p3 }
  0x17   : > { %p1994_p1 = pnand %p1992_p0, %p1982_p13 }
  0x19   : > { %p1995_p2 = pneg %p1994_p1 }
  0x1b   : > { %p2002_p7 = pnand %p2001_p6, %p1995_p2 }
  0x1d   : > { %2005 = shalt.err (!%p2002_p7)
}
  0x1e   : > { %s2073_s10 = smov 64   ;;  %s2074_s11 = smov 4  }
  0x1f   : > { %1901 = dma.hbm_to_vmem [thread:$0]  (!%p1899_p12), %s3113_s3, 512, %s180_s8, [#allocation4], %s2073_s10, %s2073_s10, %s2074_s11  }
  0x20   : > { %206 = sbr.rel (%p2164_p10) target bundleno = 1001 (0x3e9), region = 40 }
  0x25   : > { %2049 = dma.done.wait (%p1906_p9), [#allocation4], 512  }
  0x26   : > { %2051 = vsyncadd (%p1906_p9), [#allocation4], 4294966784  ;;  %s1843_s14 = sshll.u32 %s2136_s4, 3  ;;  %v3116_v0 = vlaneseq  ;;  %v2075_v1 = vmov 1   ;;  %v3117_v2 = vmov 0   ;;  %v2191_v4 = vld [vmem:[%s3111_s1 + $0x30] sm:$0xff] }
  0x27   : > { %1951 = vset.pattern.permute.xlu1 %v2075_v1  ;;  %1950 = vset.pattern.permute.xlu0 %v3117_v2  ;;  %p234_p6 = scmp.lt.s32.totalorder %s1843_s14, 31  ;;  %v2206_v8 = vld [vmem:[%s3111_s1 + $0x38] sm:$0xff]  ;;  %v2211_v9 = vld [vmem:[%s3111_s1 + $0x20] sm:$0xff]  ;;  %v2225_v15 = vld [vmem:[%s3111_s1 + $0x28] sm:$0xff]  ;;  %v2077_v21 = vmov 2   ;;  %vm523_vm0 = vcmask 523264  }
  0x28   : > { %568 = vmatprep.mubr.bf16.mxu0 %v3117_v2  ;;  %641 = vmatprep.mubr.bf16.mxu1 %v3117_v2  ;;  %v2186_v3 = vshrl.u32 %v3116_v0, 7  ;;  %v2239_v17 = vld [vmem:[%s3111_s1 + $0x18] sm:$0xff]  ;;  %v2244_v18 = vld [vmem:[%s3111_s1 + $0x10] sm:$0xff]  ;;  %v2252_v19 = vld [vmem:[%s3111_s1] sm:$0xff]  ;;  %s248_s8 = sld [smem:[#allocation2]]  ;;  %s230_s9 = sand.u32 1, %s2062_s21  }
  0x29   : > { %s3239_s14 = smov (!%p234_p6, %s1843_s14), 31  ;;  %384 = vperm.xlu1 %1951, %v2191_v4   ;;  %298 = vperm.xlu0 %1950, %v2191_v4   ;;  %v2261_v20 = vld [vmem:[%s3111_s1 + $0x8] sm:$0xff]  ;;  %s1842_s10 = sshll.u32 %s230_s9, 3 }
  0x2a   : > { %3167 = vst [vmem:[#allocation9_spill] sm:$0xff] %v2186_v3  ;;  %s2196_s19 = scalar_lea.vmem %s3110_s0, %s3239_s14  ;;  %v313_v5 = vsub.s32 1, %v2186_v3  ;;  %v309_v6 = vsub.s32 0, %v2186_v3  ;;  %v317_v7 = vsub.s32 2, %v2186_v3  ;;  %v321_v10 = vsub.s32 3, %v2186_v3  ;;  %s2951_s11 = scalar_lea.vmem [#allocation6], %s1842_s10 }
  0x2b   : > { %v1868_v11 = vld [vmem:[%s2196_s19 + $0x4] sm:$0xf]  ;;  %v265_v22 = vld [vmem:[%s2196_s19] sm:$0xf]  ;;  %s1891_s12 = sshll.u32 %s2136_s4, 7  ;;  %s1768_s13 = sshll.u32 %s2951_s11, 4  ;;  %s1769_s13 = int_to_ptr.vmem [resolvable:$true] %s1768_s13 }
  0x2c   : > { %v2215_v12 = vrot.slane %v1868_v11, %v309_v6  ;;  %v2217_v13 = vrot.slane %v1868_v11, %v317_v7  ;;  %v2219_v14 = vrot.slane %v1868_v11, %v313_v5  ;;  %v2231_v16 = vrot.slane %v1868_v11, %v321_v10  ;;  %s1766_s16 = scalar_lea.hbm %s3115_s5, %s1891_s12  ;;  %s1754_s17 = scalar_lea.sflag [#allocation5], %s230_s9 }
  0x2d   : > { %388 = vperm.xlu1 %1951, %v2206_v8   ;;  %1953 = vset.pattern.permute.xlu0 %v2075_v1  ;;  %v2275_v23 = vrot.slane %v265_v22, %v313_v5  ;;  %v2277_v24 = vrot.slane %v265_v22, %v321_v10  ;;  %v2279_v25 = vrot.slane %v265_v22, %v309_v6  ;;  %s2006_s18 = scalar_lea.vmem %s1769_s13, 128  ;;  %s2081_s4 = smov [#allocation6]  }
  0x2e   : > { %376 = vperm.xlu0 %1953, %v2211_v9   ;;  %v2281_v26 = vrot.slane %v265_v22, %v317_v7  ;;  %p2007_p8 = scmp.ne.s32.totalorder %s1769_s13, %s2006_s18  ;;  %s2010_s19 = sshll.u32 %s2081_s4, 4  ;;  %s2011_s19 = int_to_ptr.vmem [resolvable:$false] %s2010_s19 }
  0x2f   : > { %s2012_s24 = scalar_lea.vmem %s2011_s19, 256  ;;  %p2013_p11 = scmp.lt.s32.totalorder %s1769_s13, %s2011_s19 }
  0x30   : > { %p2008_p9 = pnand %p2007_p8, %p2153_p5  ;;  %p2014_p12 = scmp.lt.s32.totalorder %s2012_s24, %s2006_s18 }
  0x31   : > { %1952 = vset.pattern.permute.xlu1 %v3117_v2 }
  0x32   : > { %293 = vperm.xlu1 %1952, %v2225_v15   ;;  %1954 = vset.pattern.permute.xlu0 %v3117_v2  ;;  %p2009_p10 = pneg %p2008_p9  ;;  %p2015_p13 = por %p2014_p12, %p2013_p11 }
  0x33   : > { %303 = vperm.xlu0 %1954, %v2206_v8  }
  0x34   : > { %p2016_p0 = pnand %p2015_p13, %p2009_p10 }
  0x36   : > { %1955 = vset.pattern.permute.xlu1 %v2075_v1 }
  0x37   : > { %380 = vperm.xlu1 %1955, %v2225_v15   ;;  %288 = vperm.xlu0 %1954, %v2211_v9  }
  0x3b   : > { %1956 = vset.pattern.permute.xlu1 %v3117_v2  ;;  %283 = vperm.xlu0 %1954, %v2239_v17  }
  0x3c   : > { %278 = vperm.xlu1 %1956, %v2244_v18  }
  0x3f   : > { %268 = vperm.xlu0 %1954, %v2252_v19  }
  0x40   : > { %1957 = vset.pattern.permute.xlu1 %v2075_v1 }
  0x41   : > { %368 = vperm.xlu1 %1957, %v2244_v18  }
  0x43   : > { %1959 = vset.pattern.permute.xlu0 %v2075_v1 }
  0x44   : > { %360 = vperm.xlu0 %1959, %v2252_v19  }
  0x45   : > { %372 = vperm.xlu1 %1957, %v2239_v17  }
  0x48   : > { %1962 = vset.pattern.permute.xlu0 %v2077_v21 }
  0x49   : > { %1958 = vset.pattern.permute.xlu1 %v3117_v2  ;;  %500 = vperm.xlu0 %1962, %v2206_v8  }
  0x4a   : > { %273 = vperm.xlu1 %1958, %v2261_v20  }
  0x4d   : > { %480 = vperm.xlu0 %1962, %v2244_v18  }
  0x4e   : > { %1960 = vset.pattern.permute.xlu1 %v2075_v1 }
  0x4f   : > { %364 = vperm.xlu1 %1960, %v2261_v20  }
  0x51   : > { %472 = vperm.xlu0 %1962, %v2252_v19  }
  0x53   : > { %1961 = vset.pattern.permute.xlu1 %v2077_v21 }
  0x54   : > { %496 = vperm.xlu1 %1961, %v2191_v4  }
  0x58   : > { %488 = vperm.xlu1 %1961, %v2211_v9  }
  0x5c   : > { %492 = vperm.xlu1 %1961, %v2225_v15  }
  0x60   : > { %484 = vperm.xlu1 %1961, %v2239_v17  }
  0x64   : > { %476 = vperm.xlu1 %1961, %v2261_v20  }
  0xa4   : > { %v385_v27 = vpop.permute.xlu1 %384  ;;  %v299_v28 = vpop.permute.xlu0 %298 }
  0xa5   : > { %v352_v29 = vmul.f32 %v2275_v23, %v299_v28  ;;  %v354_v30 = vmul.f32 %v2277_v24, %v299_v28  ;;  %v351_v31 = vmul.f32 %v2279_v25, %v299_v28  ;;  %v353_v32 = vmul.f32 %v2281_v26, %v299_v28 }
  0xa6   : > { %v1175_v33 = vmul.f32 %v2219_v14, %v299_v28  ;;  %v1177_v34 = vmul.f32 %v2231_v16, %v299_v28  ;;  %v1174_v35 = vmul.f32 %v2215_v12, %v299_v28  ;;  %v1176_v36 = vmul.f32 %v2217_v13, %v299_v28 }
  0xa7   : > { %v416_v37 = vadd.f32 %v385_v27, %v352_v29  ;;  %v418_v38 = vadd.f32 %v385_v27, %v354_v30  ;;  %v415_v39 = vadd.f32 %v385_v27, %v351_v31  ;;  %v417_v46 = vadd.f32 %v385_v27, %v353_v32 }
  0xa8   : > { %v389_v40 = vpop.permute.xlu1 %388  ;;  %v2291_v41 = vadd.f32 %v1175_v33, %v385_v27  ;;  %v2293_v42 = vadd.f32 %v1177_v34, %v385_v27  ;;  %v2295_v43 = vadd.f32 %v1174_v35, %v385_v27  ;;  %v2297_v44 = vadd.f32 %v1176_v36, %v385_v27 }
  0xa9   : > { %v2299_v45 = vpop.permute.xlu0 %376  ;;  %v448_v47 = vmax.f32 %v416_v37, 0.0  ;;  %v450_v48 = vmax.f32 %v418_v38, 0.0  ;;  %v447_v49 = vmax.f32 %v415_v39, 0.0  ;;  %v449_v51 = vmax.f32 %v417_v46, 0.0 }
  0xaa   : > { %v1239_v52 = vmax.f32 %v2291_v41, 0.0  ;;  %v1241_v53 = vmax.f32 %v2293_v42, 0.0  ;;  %v1238_v54 = vmax.f32 %v2295_v43, 0.0  ;;  %v1240_v59 = vmax.f32 %v2297_v44, 0.0 }
  0xad   : > { %v2301_v50 = vpop.permute.xlu1 %293 }
  0xae   : > { %v304_v55 = vpop.permute.xlu0 %303  ;;  %v348_v56 = vmul.f32 %v2275_v23, %v2301_v50  ;;  %v350_v57 = vmul.f32 %v2277_v24, %v2301_v50  ;;  %v347_v58 = vmul.f32 %v2279_v25, %v2301_v50 }
  0xaf   : > { %v356_v60 = vmul.f32 %v2275_v23, %v304_v55  ;;  %v358_v61 = vmul.f32 %v2277_v24, %v304_v55  ;;  %v355_v62 = vmul.f32 %v2279_v25, %v304_v55  ;;  %v357_v63 = vmul.f32 %v2281_v26, %v304_v55 }
  0xb0   : > { %v1179_v1 = vmul.f32 %v2219_v14, %v304_v55  ;;  %v1181_v5 = vmul.f32 %v2231_v16, %v304_v55  ;;  %v1178_v6 = vmul.f32 %v2215_v12, %v304_v55  ;;  %v1180_v7 = vmul.f32 %v2217_v13, %v304_v55 }
  0xb1   : > { %v420_v10 = vadd.f32 %v389_v40, %v356_v60  ;;  %v422_v11 = vadd.f32 %v389_v40, %v358_v61  ;;  %v419_v21 = vadd.f32 %v389_v40, %v355_v62  ;;  %v421_v22 = vadd.f32 %v389_v40, %v357_v63 }
  0xb2   : > { %v2321_v27 = vpop.permute.xlu1 %380  ;;  %v2323_v28 = vpop.permute.xlu0 %288  ;;  %v2325_v29 = vadd.f32 %v1179_v1, %v389_v40  ;;  %v2327_v30 = vadd.f32 %v1181_v5, %v389_v40  ;;  %v2329_v31 = vadd.f32 %v1178_v6, %v389_v40  ;;  %v2331_v32 = vadd.f32 %v1180_v7, %v389_v40 }
  0xb3   : > { %v452_v33 = vmax.f32 %v420_v10, 0.0  ;;  %v454_v34 = vmax.f32 %v422_v11, 0.0  ;;  %v451_v35 = vmax.f32 %v419_v21, 0.0  ;;  %v453_v36 = vmax.f32 %v421_v22, 0.0 }
  0xb4   : > { %v344_v37 = vmul.f32 %v2275_v23, %v2323_v28  ;;  %v412_v38 = vadd.f32 %v2321_v27, %v348_v56  ;;  %v346_v39 = vmul.f32 %v2277_v24, %v2323_v28  ;;  %v414_v46 = vadd.f32 %v2321_v27, %v350_v57 }
  0xb5   : > { %v468_v55 = vpack.c.bf16 %v452_v33, %v448_v47  ;;  %v470_v60 = vpack.c.bf16 %v454_v34, %v450_v48  ;;  %v467_v61 = vpack.c.bf16 %v451_v35, %v447_v49  ;;  %v469_v62 = vpack.c.bf16 %v453_v36, %v449_v51 }
  0xb6   : > { %v2339_v40 = vpop.permute.xlu0 %283  ;;  %v408_v63 = vadd.f32 %v2299_v45, %v344_v37  ;;  %v444_v1 = vmax.f32 %v412_v38, 0.0  ;;  %v410_v5 = vadd.f32 %v2299_v45, %v346_v39  ;;  %v349_v6 = vmul.f32 %v2281_v26, %v2301_v50 }
  0xb7   : > { %544 = vmatprep.subr.bf16.mxu0 %v468_v55  ;;  %617 = vmatprep.subr.bf16.mxu1 %v470_v60  ;;  %v2345_v56 = vpop.permute.xlu1 %278  ;;  %v446_v7 = vmax.f32 %v414_v46, 0.0  ;;  %v343_v47 = vmul.f32 %v2279_v25, %v2323_v28  ;;  %v411_v48 = vadd.f32 %v2321_v27, %v347_v58  ;;  %v345_v49 = vmul.f32 %v2281_v26, %v2323_v28 }
  0xb8   : > { %545 = vmatpush1.bf16.msra.mxu0 %v467_v61  ;;  %618 = vmatpush1.bf16.msra.mxu1 %v469_v62  ;;  %v440_v51 = vmax.f32 %v408_v63, 0.0  ;;  %v442_v57 = vmax.f32 %v410_v5, 0.0  ;;  %v413_v10 = vadd.f32 %v2321_v27, %v349_v6  ;;  %v336_v11 = vmul.f32 %v2275_v23, %v2345_v56 }
  0xb9   : > { %v407_v21 = vadd.f32 %v2299_v45, %v343_v47  ;;  %v443_v22 = vmax.f32 %v411_v48, 0.0  ;;  %v409_v33 = vadd.f32 %v2299_v45, %v345_v49  ;;  %v340_v58 = vmul.f32 %v2275_v23, %v2339_v40 }
  0xba   : > { %v2359_v34 = vpop.permute.xlu0 %268  ;;  %v464_v35 = vpack.c.bf16 %v444_v1, %v440_v51  ;;  %v466_v36 = vpack.c.bf16 %v446_v7, %v442_v57  ;;  %v445_v37 = vmax.f32 %v413_v10, 0.0  ;;  %v338_v38 = vmul.f32 %v2277_v24, %v2345_v56 }
  0xbb   : > { %v439_v39 = vmax.f32 %v407_v21, 0.0  ;;  %v441_v46 = vmax.f32 %v409_v33, 0.0  ;;  %v342_v55 = vmul.f32 %v2277_v24, %v2339_v40  ;;  %v335_v60 = vmul.f32 %v2279_v25, %v2345_v56 }
  0xbc   : > { %546 = vmatprep.subr.bf16.mxu0 %v464_v35  ;;  %619 = vmatprep.subr.bf16.mxu1 %v466_v36  ;;  %v2367_v61 = vpop.permute.xlu1 %368  ;;  %v339_v62 = vmul.f32 %v2279_v25, %v2339_v40  ;;  %v337_v63 = vmul.f32 %v2281_v26, %v2345_v56  ;;  %v341_v1 = vmul.f32 %v2281_v26, %v2339_v40  ;;  %v1243_v5 = vmax.f32 %v2325_v29, 0.0 }
  0xbd   : > { %v463_v6 = vpack.c.bf16 %v443_v22, %v439_v39  ;;  %v465_v7 = vpack.c.bf16 %v445_v37, %v441_v46  ;;  %v400_v47 = vadd.f32 %v2367_v61, %v336_v11  ;;  %v402_v48 = vadd.f32 %v2367_v61, %v338_v38 }
  0xbe   : > { %v399_v49 = vadd.f32 %v2367_v61, %v335_v60  ;;  %v401_v51 = vadd.f32 %v2367_v61, %v337_v63  ;;  %v328_v57 = vmul.f32 %v2275_v23, %v2359_v34  ;;  %v330_v10 = vmul.f32 %v2277_v24, %v2359_v34 }
  0xbf   : > { %547 = vmatpush1.bf16.msra.mxu0 %v463_v6  ;;  %620 = vmatpush1.bf16.msra.mxu1 %v465_v7  ;;  %v2384_v21 = vpop.permute.xlu0 %360  ;;  %v432_v29 = vmax.f32 %v400_v47, 0.0  ;;  %v434_v22 = vmax.f32 %v402_v48, 0.0  ;;  %v327_v11 = vmul.f32 %v2279_v25, %v2359_v34  ;;  %v1245_v33 = vmax.f32 %v2327_v30, 0.0 }
  0xc0   : > { %v2389_v35 = vpop.permute.xlu1 %372  ;;  %v431_v36 = vmax.f32 %v399_v49, 0.0  ;;  %v2392_v37 = vadd.f32 %v2384_v21, %v328_v57  ;;  %v2395_v38 = vadd.f32 %v2384_v21, %v330_v10  ;;  %v329_v39 = vmul.f32 %v2281_v26, %v2359_v34 }
  0xc1   : > { %v404_v46 = vadd.f32 %v2389_v35, %v340_v58  ;;  %v406_v60 = vadd.f32 %v2389_v35, %v342_v55  ;;  %v403_v63 = vadd.f32 %v2389_v35, %v339_v62  ;;  %v405_v30 = vadd.f32 %v2389_v35, %v341_v1 }
  0xc2   : > { %v433_v6 = vmax.f32 %v401_v51, 0.0  ;;  %v424_v7 = vmax.f32 %v2392_v37, 0.0  ;;  %v426_v47 = vmax.f32 %v2395_v38, 0.0  ;;  %v391_v48 = vadd.f32 %v2384_v21, %v327_v11 }
  0xc3   : > { %v436_v49 = vmax.f32 %v404_v46, 0.0  ;;  %v438_v57 = vmax.f32 %v406_v60, 0.0  ;;  %v435_v10 = vmax.f32 %v403_v63, 0.0  ;;  %v437_v0 = vmax.f32 %v405_v30, 0.0 }
  0xc4   : > { %v423_v2 = vmax.f32 %v391_v48, 0.0  ;;  %v393_v58 = vadd.f32 %v2384_v21, %v329_v39  ;;  %v2409_v55 = vpack.c.bf16 %v1243_v5, %v1239_v52  ;;  %v2413_v62 = vpack.c.bf16 %v1245_v33, %v1241_v53 }
  0xc5   : > { %v2415_v1 = vpop.permute.xlu1 %273  ;;  %v460_v51 = vpack.c.bf16 %v436_v49, %v432_v29  ;;  %v462_v37 = vpack.c.bf16 %v438_v57, %v434_v22  ;;  %v459_v11 = vpack.c.bf16 %v435_v10, %v431_v36  ;;  %v461_v38 = vpack.c.bf16 %v437_v0, %v433_v6 }
  0xc6   : > { %v332_v46 = vmul.f32 %v2275_v23, %v2415_v1  ;;  %v334_v39 = vmul.f32 %v2277_v24, %v2415_v1  ;;  %v331_v41 = vmul.f32 %v2279_v25, %v2415_v1  ;;  %v333_v42 = vmul.f32 %v2281_v26, %v2415_v1 }
  0xc7   : > { %548 = vmatprep.subr.bf16.mxu0 %v460_v51  ;;  %621 = vmatprep.subr.bf16.mxu1 %v462_v37  ;;  %v1242_v52 = vmax.f32 %v2329_v31, 0.0  ;;  %v1244_v53 = vmax.f32 %v2331_v32, 0.0  ;;  %v1167_v0 = vmul.f32 %v2219_v14, %v2323_v28  ;;  %v1171_v23 = vmul.f32 %v2219_v14, %v2301_v50 }
  0xc8   : > { %549 = vmatpush1.bf16.msra.mxu0 %v459_v11  ;;  %622 = vmatpush1.bf16.msra.mxu1 %v461_v38  ;;  %v425_v24 = vmax.f32 %v393_v58, 0.0  ;;  %v1169_v25 = vmul.f32 %v2231_v16, %v2323_v28  ;;  %v1173_v26 = vmul.f32 %v2231_v16, %v2301_v50  ;;  %v1166_v31 = vmul.f32 %v2215_v12, %v2323_v28 }
  0xc9   : > { %v2439_v32 = vpack.c.bf16 %v1242_v52, %v1238_v54  ;;  %v2443_v5 = vpack.c.bf16 %v1244_v53, %v1240_v59  ;;  %v1199_v29 = vadd.f32 %v1167_v0, %v2299_v45  ;;  %v1203_v22 = vadd.f32 %v1171_v23, %v2321_v27 }
  0xca   : > { %v2447_v33 = vpop.permute.xlu1 %364  ;;  %v1201_v36 = vadd.f32 %v1169_v25, %v2299_v45  ;;  %v1205_v60 = vadd.f32 %v1173_v26, %v2321_v27  ;;  %v1170_v63 = vmul.f32 %v2215_v12, %v2301_v50  ;;  %v1198_v43 = vadd.f32 %v1166_v31, %v2299_v45  ;;  %v2472_v31 = vld [vmem:[%s3112_s2] sm:$0xff]  }
  0xcb   : > { %v396_v54 = vadd.f32 %v2447_v33, %v332_v46  ;;  %v398_v44 = vadd.f32 %v2447_v33, %v334_v39  ;;  %v395_v59 = vadd.f32 %v2447_v33, %v331_v41  ;;  %v397_v30 = vadd.f32 %v2447_v33, %v333_v42  ;;  %3168 = vst [vmem:[#allocation10_spill] sm:$0xff] %v2472_v31 }
  0xcc   : > { %v1231_v6 = vmax.f32 %v1199_v29, 0.0  ;;  %v1235_v48 = vmax.f32 %v1203_v22, 0.0  ;;  %v1233_v49 = vmax.f32 %v1201_v36, 0.0  ;;  %v1237_v57 = vmax.f32 %v1205_v60, 0.0 }
  0xcd   : > { %v428_v10 = vmax.f32 %v396_v54, 0.0  ;;  %v430_v58 = vmax.f32 %v398_v44, 0.0  ;;  %v427_v51 = vmax.f32 %v395_v59, 0.0  ;;  %v429_v37 = vmax.f32 %v397_v30, 0.0 }
  0xce   : > { %v2458_v11 = vpack.c.bf16 %v1235_v48, %v1231_v6  ;;  %v2460_v38 = vpack.c.bf16 %v1237_v57, %v1233_v49  ;;  %v1202_v46 = vadd.f32 %v1170_v63, %v2321_v27  ;;  %v1230_v52 = vmax.f32 %v1198_v43, 0.0 }
  0xcf   : > { %v456_v39 = vpack.c.bf16 %v428_v10, %v424_v7  ;;  %v458_v53 = vpack.c.bf16 %v430_v58, %v426_v47  ;;  %v455_v41 = vpack.c.bf16 %v427_v51, %v423_v2  ;;  %v457_v0 = vpack.c.bf16 %v429_v37, %v425_v24 }
  0xd0   : > { %v1234_v42 = vmax.f32 %v1202_v46, 0.0  ;;  %v1168_v23 = vmul.f32 %v2217_v13, %v2323_v28  ;;  %v1172_v25 = vmul.f32 %v2217_v13, %v2301_v50  ;;  %v1159_v26 = vmul.f32 %v2219_v14, %v2345_v56 }
  0xd1   : > { %550 = vmatprep.subr.bf16.mxu0 %v456_v39  ;;  %623 = vmatprep.subr.bf16.mxu1 %v458_v53  ;;  %v1163_v2 = vmul.f32 %v2219_v14, %v2339_v40  ;;  %v1161_v7 = vmul.f32 %v2231_v16, %v2345_v56  ;;  %v1165_v28 = vmul.f32 %v2231_v16, %v2339_v40  ;;  %v3169_v6 = vmov 0  }
  0xd2   : > { %551 = vmatpush1.bf16.msra.mxu0 %v455_v41  ;;  %624 = vmatpush1.bf16.msra.mxu1 %v457_v0  ;;  %v2480_v50 = vpack.c.bf16 %v1234_v42, %v1230_v52  ;;  %v1200_v47 = vadd.f32 %v1168_v23, %v2299_v45  ;;  %v1204_v24 = vadd.f32 %v1172_v25, %v2321_v27  ;;  %v2517_v41 = vld [vmem:[%s3112_s2 + $0x8] sm:$0xff]  }
  0xd3   : > { %v1191_v29 = vadd.f32 %v1159_v26, %v2367_v61  ;;  %v1195_v22 = vadd.f32 %v1163_v2, %v2389_v35  ;;  %v1193_v36 = vadd.f32 %v1161_v7, %v2367_v61  ;;  %v1197_v60 = vadd.f32 %v1165_v28, %v2389_v35  ;;  %3172 = vst [vmem:[#allocation13_spill] sm:$0xff] %v2517_v41 }
  0xd4   : > { %v1232_v63 = vmax.f32 %v1200_v47, 0.0  ;;  %v1236_v43 = vmax.f32 %v1204_v24, 0.0  ;;  %v1158_v54 = vmul.f32 %v2215_v12, %v2345_v56  ;;  %v1162_v44 = vmul.f32 %v2215_v12, %v2339_v40 }
  0xd5   : > { %1848 = vmatmul.mubr.msk.bf16.vlgmr.msra.gmra.mxu0 %vm523_vm0, %v2472_v31  ;;  %1852 = vmatmul.mubr.msk.bf16.vlgmr.msra.gmra.mxu1 %vm523_vm0, %v2472_v31  ;;  %v1223_v45 = vmax.f32 %v1191_v29, 0.0  ;;  %v1227_v27 = vmax.f32 %v1195_v22, 0.0  ;;  %v1225_v59 = vmax.f32 %v1193_v36, 0.0  ;;  %v1229_v30 = vmax.f32 %v1197_v60, 0.0 }
  0xd6   : > { %578 = vmatprep.mubr.bf16.mxu0 %v3169_v6  ;;  %651 = vmatprep.mubr.bf16.mxu1 %v3169_v6  ;;  %v2498_v48 = vpack.c.bf16 %v1236_v43, %v1232_v63  ;;  %v1190_v49 = vadd.f32 %v1158_v54, %v2367_v61  ;;  %v1194_v57 = vadd.f32 %v1162_v44, %v2389_v35 }
  0xd7   : > { %v2502_v10 = vpack.c.bf16 %v1227_v27, %v1223_v45  ;;  %v2504_v58 = vpack.c.bf16 %v1229_v30, %v1225_v59  ;;  %v1160_v51 = vmul.f32 %v2217_v13, %v2345_v56  ;;  %v1164_v37 = vmul.f32 %v2217_v13, %v2339_v40 }
  0xd8   : > { %v1222_v46 = vmax.f32 %v1190_v49, 0.0  ;;  %v1226_v52 = vmax.f32 %v1194_v57, 0.0  ;;  %v1151_v39 = vmul.f32 %v2219_v14, %v2359_v34  ;;  %v1155_v53 = vmul.f32 %v2219_v14, %v2415_v1 }
  0xd9   : > { %3170 = vst [vmem:[#allocation11_spill] sm:$0xff] %v2502_v10  ;;  %3171 = vst [vmem:[#allocation12_spill] sm:$0xff] %v2504_v58  ;;  %v1192_v0 = vadd.f32 %v1160_v51, %v2367_v61  ;;  %v1196_v56 = vadd.f32 %v1164_v37, %v2389_v35  ;;  %v1153_v40 = vmul.f32 %v2231_v16, %v2359_v34  ;;  %v2595_v37 = vpop.permute.xlu1 %496 }
  0xda   : > { %v1157_v42 = vmul.f32 %v2231_v16, %v2415_v1  ;;  %v2525_v23 = vpack.c.bf16 %v1226_v52, %v1222_v46  ;;  %v1183_v25 = vadd.f32 %v1151_v39, %v2384_v21  ;;  %v1187_v14 = vadd.f32 %v1155_v53, %v2447_v33  ;;  %3181 = vst [vmem:[#allocation22_spill] sm:$0xff] %v2595_v37 }
  0xdb   : > { %v1150_v26 = vmul.f32 %v2215_v12, %v2359_v34  ;;  %v1224_v2 = vmax.f32 %v1192_v0, 0.0  ;;  %v1228_v7 = vmax.f32 %v1196_v56, 0.0  ;;  %v1185_v61 = vadd.f32 %v1153_v40, %v2384_v21 }
  0xdc   : > { %3173 = vst [vmem:[#allocation14_spill] sm:$0xff] %v2525_v23  ;;  %v1189_v35 = vadd.f32 %v1157_v42, %v2447_v33  ;;  %v1215_v28 = vmax.f32 %v1183_v25, 0.0  ;;  %v1219_v47 = vmax.f32 %v1187_v14, 0.0  ;;  %v1154_v16 = vmul.f32 %v2215_v12, %v2415_v1  ;;  %v2612_v14 = vpop.permute.xlu0 %500 }
  0xdd   : > { %v1182_v24 = vadd.f32 %v1150_v26, %v2384_v21  ;;  %1849 = vmatmul.mubr.msk.bf16.gmra.mxu0 %vm523_vm0, %v2517_v41  ;;  %1853 = vmatmul.mubr.msk.bf16.gmra.mxu1 %vm523_vm0, %v2517_v41  ;;  %v2540_v29 = vpack.c.bf16 %v1228_v7, %v1224_v2  ;;  %v1217_v22 = vmax.f32 %v1185_v61, 0.0  ;;  %v1152_v60 = vmul.f32 %v2217_v13, %v2359_v34  ;;  %v2558_v34 = vld [vmem:[%s3112_s2 + $0x10] sm:$0xff]   ;;  %v2604_v53 = vpop.permute.xlu1 %488 }
  0xde   : > { %v1221_v36 = vmax.f32 %v1189_v35, 0.0  ;;  %588 = vmatprep.mubr.bf16.mxu0 %v3169_v6  ;;  %661 = vmatprep.mubr.bf16.mxu1 %v3169_v6  ;;  %v2546_v12 = vpack.c.bf16 %v1219_v47, %v1215_v28  ;;  %v1186_v63 = vadd.f32 %v1154_v16, %v2447_v33  ;;  %v1156_v43 = vmul.f32 %v2217_v13, %v2415_v1  ;;  %v2573_v13 = vld [vmem:[%s3112_s2 + $0x18] sm:$0xff]  }
  0xdf   : > { %3174 = vst [vmem:[#allocation15_spill] sm:$0xff] %v2540_v29  ;;  %v1184_v44 = vadd.f32 %v1152_v60, %v2384_v21  ;;  %v1214_v45 = vmax.f32 %v1182_v24, 0.0  ;;  %3177 = vst [vmem:[#allocation18_spill] sm:$0xff] %v2558_v34  ;;  %v2078_v21 = vmov 3   ;;  %v2079_v1 = vmov 4  }
  0xe0   : > { %3175 = vst [vmem:[#allocation16_spill] sm:$0xff] %v2546_v12  ;;  %v2551_v54 = vpack.c.bf16 %v1221_v36, %v1217_v22  ;;  %v1218_v27 = vmax.f32 %v1186_v63, 0.0  ;;  %v1188_v59 = vadd.f32 %v1156_v43, %v2447_v33  ;;  %3180 = vst [vmem:[#allocation21_spill] sm:$0xff] %v2573_v13  ;;  %1963 = vset.pattern.permute.xlu1 %v2078_v21  ;;  %1965 = vset.pattern.permute.xlu0 %v2079_v1  ;;  %v2617_v47 = vpop.permute.xlu0 %480 }
  0xe1   : > { %v1216_v49 = vmax.f32 %v1184_v44, 0.0  ;;  %735 = vperm.xlu1 %1963, %v2261_v20   ;;  %977 = vperm.xlu0 %1965, %v2261_v20  }
  0xe2   : > { %3176 = vst [vmem:[#allocation17_spill] sm:$0xff] %v2551_v54  ;;  %v2560_v30 = vpack.c.bf16 %v1218_v27, %v1214_v45  ;;  %v1220_v57 = vmax.f32 %v1188_v59, 0.0 }
  0xe4   : > { %3178 = vst [vmem:[#allocation19_spill] sm:$0xff] %v2560_v30  ;;  %v2562_v51 = vpack.c.bf16 %v1220_v57, %v1216_v49  ;;  %v2621_v43 = vpop.permute.xlu0 %472 }
  0xe5   : > { %1850 = vmatmul.mubr.msk.bf16.gmra.mxu0 %vm523_vm0, %v2558_v34  ;;  %1854 = vmatmul.mubr.msk.bf16.gmra.mxu1 %vm523_vm0, %v2558_v34 }
  0xe6   : > { %3179 = vst [vmem:[#allocation20_spill] sm:$0xff] %v2562_v51  ;;  %598 = vmatprep.mubr.bf16.mxu0 %v3169_v6  ;;  %671 = vmatprep.mubr.bf16.mxu1 %v3169_v6 }
  0xe7   : > { %739 = vperm.xlu1 %1963, %v2244_v18   ;;  %1966 = vset.pattern.permute.xlu0 %v2078_v21 }
  0xe8   : > { %731 = vperm.xlu0 %1966, %v2252_v19  }
  0xeb   : > { %1964 = vset.pattern.permute.xlu1 %v2079_v1 }
  0xec   : > { %973 = vperm.xlu1 %1964, %v2252_v19   ;;  %743 = vperm.xlu0 %1966, %v2239_v17  }
  0xed   : > { %1851 = vmatmul.mubr.msk.bf16.gmra.mxu0 %vm523_vm0, %v2573_v13  ;;  %1855 = vmatmul.mubr.msk.bf16.gmra.mxu1 %vm523_vm0, %v2573_v13 }
  0xee   : > { %826 = vmatprep.mubr.bf16.mxu0 %v3169_v6  ;;  %899 = vmatprep.mubr.bf16.mxu1 %v3169_v6 }
  0xf0   : > { %1967 = vset.pattern.permute.xlu1 %v2078_v21  ;;  %751 = vperm.xlu0 %1966, %v2225_v15  }
  0xf1   : > { %747 = vperm.xlu1 %1967, %v2211_v9  }
  0xf4   : > { %1970 = vset.pattern.permute.xlu0 %v2079_v1 }
  0xf5   : > { %1968 = vset.pattern.permute.xlu1 %v2079_v1  ;;  %989 = vperm.xlu0 %1970, %v2211_v9  }
  0xf6   : > { %981 = vperm.xlu1 %1968, %v2244_v18  }
  0xf9   : > { %997 = vperm.xlu0 %1970, %v2191_v4  }
  0xfa   : > { %985 = vperm.xlu1 %1968, %v2239_v17  }
  0xfe   : > { %1969 = vset.pattern.permute.xlu1 %v2078_v21 }
  0xff   : > { %755 = vperm.xlu1 %1969, %v2191_v4   ;;  %v2614_v4 = vpop.permute.xlu1 %492 }
 0x100   : > { %3182 = vst [vmem:[#allocation23_spill] sm:$0xff] %v2614_v4 }
 0x103   : > { %759 = vperm.xlu1 %1969, %v2206_v8   ;;  %v2619_v16 = vpop.permute.xlu1 %484 }
 0x104   : > { %3183 = vst [vmem:[#allocation24_spill] sm:$0xff] %v2619_v16 }
 0x107   : > { %1971 = vset.pattern.permute.xlu1 %v2079_v1  ;;  %v2623_v44 = vpop.permute.xlu1 %476 }
 0x108   : > { %993 = vperm.xlu1 %1971, %v2225_v15  }
 0x10c   : > { %1001 = vperm.xlu1 %1971, %v2206_v8  }
 0x195   : > { %v2591_v33 = vpop.f32.mrf.mxu0  ;;  %v2593_v20 = vpop.f32.mrf.mxu1 }
 0x197   : > { %v572_v19 = vpop.f32.mrf.mxu0  ;;  %v645_v46 = vpop.f32.mrf.mxu1 }
 0x198   : > { %v2626_v45 = vadd.f32 %v572_v19, %v2621_v43  ;;  %v2629_v8 = vadd.f32 %v645_v46, %v2621_v43 }
 0x199   : > { %v2599_v52 = vpop.f32.mrf.mxu0  ;;  %v2601_v18 = vpop.f32.mrf.mxu1 }
 0x19b   : > { %v576_v17 = vpop.f32.mrf.mxu0  ;;  %v649_v39 = vpop.f32.mrf.mxu1 }
 0x19c   : > { %v2632_v27 = vadd.f32 %v576_v17, %v2623_v44  ;;  %v2635_v59 = vadd.f32 %v649_v39, %v2623_v44 }
 0x19d   : > { %v2607_v0 = vpop.f32.mrf.mxu0  ;;  %v2609_v9 = vpop.f32.mrf.mxu1 }
 0x19f   : > { %v582_v56 = vpop.f32.mrf.mxu0  ;;  %v655_v40 = vpop.f32.mrf.mxu1 }
 0x1a0   : > { %v2638_v21 = vadd.f32 %v582_v56, %v2617_v47  ;;  %v2641_v1 = vadd.f32 %v655_v40, %v2617_v47 }
 0x1a1   : > { %v584_v42 = vpop.f32.mrf.mxu0  ;;  %v657_v25 = vpop.f32.mrf.mxu1 }
 0x1a2   : > { %v2644_v19 = vadd.f32 %v584_v42, %v2619_v16  ;;  %v2647_v46 = vadd.f32 %v657_v25, %v2619_v16 }
 0x1a3   : > { %v586_v26 = vpop.f32.mrf.mxu0  ;;  %v659_v2 = vpop.f32.mrf.mxu1 }
 0x1a4   : > { %v2650_v17 = vadd.f32 %v586_v26, %v2619_v16  ;;  %v2653_v39 = vadd.f32 %v659_v2, %v2619_v16 }
 0x1a5   : > { %v590_v7 = vpop.f32.mrf.mxu0  ;;  %v663_v61 = vpop.f32.mrf.mxu1 }
 0x1a7   : > { %v592_v35 = vpop.f32.mrf.mxu0  ;;  %v665_v28 = vpop.f32.mrf.mxu1 }
 0x1a8   : > { %v593_v26 = vadd.f32 %v592_v35, %v2604_v53  ;;  %v666_v31 = vadd.f32 %v665_v28, %v2604_v53 }
 0x1a9   : > { %v594_v24 = vpop.f32.mrf.mxu0  ;;  %v667_v22 = vpop.f32.mrf.mxu1 }
 0x1aa   : > { %v595_v51 = vadd.f32 %v594_v24, %v2614_v4  ;;  %v699_v58 = vmax.f32 %v593_v26, 0.0 }
 0x1ab   : > { %v596_v36 = vpop.f32.mrf.mxu0  ;;  %v669_v15 = vpop.f32.mrf.mxu1 }
 0x1ac   : > { %v597_v3 = vadd.f32 %v596_v36, %v2614_v4  ;;  %v670_v56 = vadd.f32 %v669_v15, %v2614_v4  ;;  %v702_v10 = vmax.f32 %v595_v51, 0.0  ;;  %v694_v51 = vmax.f32 %v2644_v19, 0.0 }
 0x1ad   : > { %v600_v60 = vpop.f32.mrf.mxu0  ;;  %v673_v63 = vpop.f32.mrf.mxu1  ;;  %v683_v19 = vmax.f32 %v2626_v45, 0.0  ;;  %v3185_v45 = vld [vmem:[#allocation12_spill] sm:$0xff] }
 0x1ae   : > { %v601_v2 = vadd.f32 %v600_v60, %v2595_v37  ;;  %v674_v36 = vadd.f32 %v673_v63, %v2595_v37  ;;  %v703_v30 = vmax.f32 %v597_v3, 0.0  ;;  %v591_v63 = vadd.f32 %v590_v7, %v2604_v53 }
 0x1af   : > { %v602_v49 = vpop.f32.mrf.mxu0  ;;  %v675_v57 = vpop.f32.mrf.mxu1  ;;  %v581_v7 = vadd.f32 %v2607_v0, %v2617_v47  ;;  %v696_v0 = vmax.f32 %v2647_v46, 0.0 }
 0x1b0   : > { %v603_v40 = vadd.f32 %v602_v49, %v2595_v37  ;;  %v676_v42 = vadd.f32 %v675_v57, %v2595_v37  ;;  %v668_v49 = vadd.f32 %v667_v22, %v2614_v4  ;;  %v664_v37 = vadd.f32 %v663_v61, %v2604_v53 }
 0x1b1   : > { %v604_v13 = vpop.f32.mrf.mxu0  ;;  %v677_v34 = vpop.f32.mrf.mxu1  ;;  %v706_v23 = vmax.f32 %v601_v2, 0.0  ;;  %v708_v24 = vmax.f32 %v674_v36, 0.0  ;;  %v701_v22 = vmax.f32 %v666_v31, 0.0  ;;  %v654_v31 = vadd.f32 %v2609_v9, %v2617_v47 }
 0x1b2   : > { %v605_v41 = vadd.f32 %v604_v13, %v2612_v14  ;;  %v678_v25 = vadd.f32 %v677_v34, %v2612_v14  ;;  %v705_v34 = vmax.f32 %v670_v56, 0.0  ;;  %v707_v12 = vmax.f32 %v603_v40, 0.0 }
 0x1b3   : > { %v606_v16 = vpop.f32.mrf.mxu0  ;;  %v679_v15 = vpop.f32.mrf.mxu1  ;;  %v709_v28 = vmax.f32 %v676_v42, 0.0  ;;  %v697_v40 = vmax.f32 %v2653_v39, 0.0  ;;  %v723_v42 = vpack.c.bf16 %v703_v30, %v699_v58  ;;  %v691_v58 = vmax.f32 %v2638_v21, 0.0 }
 0x1b4   : > { %v607_v57 = vadd.f32 %v606_v16, %v2612_v14  ;;  %v680_v13 = vadd.f32 %v679_v15, %v2612_v14  ;;  %v710_v54 = vmax.f32 %v605_v41, 0.0  ;;  %v712_v35 = vmax.f32 %v678_v25, 0.0 }
 0x1b5   : > { %v704_v15 = vmax.f32 %v668_v49, 0.0  ;;  %v695_v41 = vmax.f32 %v2650_v17, 0.0  ;;  %v725_v25 = vpack.c.bf16 %v705_v34, %v701_v22  ;;  %v693_v30 = vmax.f32 %v2641_v1, 0.0  ;;  %v2733_v34 = vld [vmem:[#allocation3 + $0x18] sm:$0xff]  }
 0x1b6   : > { %v711_v29 = vmax.f32 %v607_v57, 0.0  ;;  %v713_v60 = vmax.f32 %v680_v13, 0.0  ;;  %v726_v3 = vpack.c.bf16 %v710_v54, %v706_v23  ;;  %v728_v56 = vpack.c.bf16 %v712_v35, %v708_v24  ;;  %v2693_v13 = vld [vmem:[#allocation3] sm:$0xff]   ;;  %v3192_v35 = vld [vmem:[#allocation10_spill] sm:$0xff]  ;;  %v2765_v24 = vpop.permute.xlu1 %735 }
 0x1b7   : > { %v575_v23 = vadd.f32 %v2599_v52, %v2623_v44  ;;  %v648_v54 = vadd.f32 %v2601_v18, %v2623_v44  ;;  %v689_v61 = vmax.f32 %v2635_v59, 0.0  ;;  %v719_v52 = vpack.c.bf16 %v695_v41, %v691_v58 }
 0x1b8   : > { %v727_v4 = vpack.c.bf16 %v711_v29, %v707_v12  ;;  %v729_v16 = vpack.c.bf16 %v713_v60, %v709_v28  ;;  %v698_v29 = vmax.f32 %v591_v63, 0.0  ;;  %v700_v12 = vmax.f32 %v664_v37, 0.0  ;;  %v3193_v28 = vld [vmem:[#allocation13_spill] sm:$0xff]  ;;  %v3194_v60 = vld [vmem:[#allocation18_spill] sm:$0xff] }
 0x1b9   : > { %v721_v17 = vpack.c.bf16 %v697_v40, %v693_v30  ;;  %v571_v18 = vadd.f32 %v2591_v33, %v2621_v43  ;;  %v644_v21 = vadd.f32 %v2593_v20, %v2621_v43  ;;  %v690_v1 = vmax.f32 %v581_v7, 0.0  ;;  %v3195_v63 = vld [vmem:[#allocation21_spill] sm:$0xff] }
 0x1ba   : > { %802 = vmatprep.subr.bf16.mxu0 %v727_v4  ;;  %875 = vmatprep.subr.bf16.mxu1 %v729_v16  ;;  %v722_v9 = vpack.c.bf16 %v702_v10, %v698_v29  ;;  %v724_v37 = vpack.c.bf16 %v704_v15, %v700_v12  ;;  %v687_v4 = vmax.f32 %v2632_v27, 0.0  ;;  %v692_v39 = vmax.f32 %v654_v31, 0.0  ;;  %v2767_v22 = vpop.permute.xlu1 %739  ;;  %v2771_v15 = vpop.permute.xlu0 %977 }
 0x1bb   : > { %803 = vmatpush1.bf16.msra.mxu0 %v726_v3  ;;  %876 = vmatpush1.bf16.msra.mxu1 %v728_v56  ;;  %v685_v10 = vmax.f32 %v2629_v8, 0.0  ;;  %v686_v27 = vmax.f32 %v575_v23, 0.0  ;;  %v688_v59 = vmax.f32 %v648_v54, 0.0  ;;  %v718_v46 = vpack.c.bf16 %v694_v51, %v690_v1  ;;  %v3191_v8 = vld [vmem:[#allocation20_spill] sm:$0xff] }
 0x1bc   : > { %804 = vmatprep.subr.bf16.mxu0 %v723_v42  ;;  %877 = vmatprep.subr.bf16.mxu1 %v725_v25  ;;  %v720_v26 = vpack.c.bf16 %v696_v0, %v692_v39  ;;  %v715_v2 = vpack.c.bf16 %v687_v4, %v683_v19  ;;  %v682_v33 = vmax.f32 %v571_v18, 0.0  ;;  %v684_v49 = vmax.f32 %v644_v21, 0.0 }
 0x1bd   : > { %v717_v36 = vpack.c.bf16 %v689_v61, %v685_v10 }
 0x1be   : > { %v714_v20 = vpack.c.bf16 %v686_v27, %v682_v33  ;;  %v716_v57 = vpack.c.bf16 %v688_v59, %v684_v49  ;;  %v2769_v16 = vpop.permute.xlu1 %973  ;;  %v2775_v56 = vpop.permute.xlu0 %731 }
 0x1bf   : > { %805 = vmatpush1.bf16.msra.mxu0 %v722_v9  ;;  %878 = vmatpush1.bf16.msra.mxu1 %v724_v37  ;;  %3197 = vst [vmem:[#allocation12_spill] sm:$0xff] %v2769_v16 }
 0x1c0   : > { %806 = vmatprep.subr.bf16.mxu0 %v719_v52  ;;  %879 = vmatprep.subr.bf16.mxu1 %v721_v17 }
 0x1c2   : > { %v2773_v3 = vpop.permute.xlu1 %747  ;;  %v2788_v18 = vpop.permute.xlu0 %743 }
 0x1c3   : > { %807 = vmatpush1.bf16.msra.mxu0 %v718_v46  ;;  %880 = vmatpush1.bf16.msra.mxu1 %v720_v26 }
 0x1c4   : > { %808 = vmatprep.subr.bf16.mxu0 %v715_v2  ;;  %881 = vmatprep.subr.bf16.mxu1 %v717_v36 }
 0x1c6   : > { %v2777_v41 = vpop.permute.xlu1 %981 }
 0x1c7   : > { %809 = vmatpush1.bf16.msra.mxu0 %v714_v20  ;;  %882 = vmatpush1.bf16.msra.mxu1 %v716_v57 }
 0x1c8   : > { %1270 = vmatprep.subr.bf16.mxu0 %v2409_v55  ;;  %1343 = vmatprep.subr.bf16.mxu1 %v2413_v62  ;;  %v2707_v55 = vld [vmem:[#allocation3 + $0x8] sm:$0xff]   ;;  %v3184_v62 = vld [vmem:[#allocation11_spill] sm:$0xff] }
 0x1c9   : > { %3196 = vst [vmem:[#allocation11_spill] sm:$0xff] %v2767_v22 }
 0x1ca   : > { %1860 = vmatmul.mubr.msk.bf16.vlgmr.msra.gmra.mxu0 %vm523_vm0, %v2693_v13  ;;  %1864 = vmatmul.mubr.msk.bf16.vlgmr.msra.gmra.mxu1 %vm523_vm0, %v2693_v13  ;;  %v2784_v51 = vpop.permute.xlu1 %985 }
 0x1cb   : > { %1271 = vmatpush1.bf16.msra.mxu0 %v2439_v32  ;;  %1344 = vmatpush1.bf16.msra.mxu1 %v2443_v5  ;;  %v3186_v32 = vld [vmem:[#allocation14_spill] sm:$0xff]  ;;  %v3187_v5 = vld [vmem:[#allocation15_spill] sm:$0xff] }
 0x1cc   : > { %1272 = vmatprep.subr.bf16.mxu0 %v2458_v11  ;;  %1345 = vmatprep.subr.bf16.mxu1 %v2460_v38  ;;  %v3188_v11 = vld [vmem:[#allocation16_spill] sm:$0xff]  ;;  %v3189_v38 = vld [vmem:[#allocation17_spill] sm:$0xff]  ;;  %3198 = vst [vmem:[#allocation14_spill] sm:$0xff] %v2771_v15  ;;  %3199 = vst [vmem:[#allocation15_spill] sm:$0xff] %v2773_v3 }
 0x1cd   : > { %836 = vmatprep.mubr.bf16.mxu0 %v3169_v6  ;;  %909 = vmatprep.mubr.bf16.mxu1 %v3169_v6  ;;  %3200 = vst [vmem:[#allocation16_spill] sm:$0xff] %v2777_v41  ;;  %3201 = vst [vmem:[#allocation17_spill] sm:$0xff] %v2784_v51 }
 0x1cf   : > { %1273 = vmatpush1.bf16.msra.mxu0 %v2480_v50  ;;  %1346 = vmatpush1.bf16.msra.mxu1 %v2498_v48  ;;  %v2723_v50 = vld [vmem:[#allocation3 + $0x10] sm:$0xff]   ;;  %v3190_v48 = vld [vmem:[#allocation19_spill] sm:$0xff] }
 0x1d0   : > { %1274 = vmatprep.subr.bf16.mxu0 %v3184_v62  ;;  %1347 = vmatprep.subr.bf16.mxu1 %v3185_v45  ;;  %3202 = vst [vmem:[#allocation19_spill] sm:$0xff] %v2788_v18 }
 0x1d2   : > { %1861 = vmatmul.mubr.msk.bf16.gmra.mxu0 %vm523_vm0, %v2707_v55  ;;  %1865 = vmatmul.mubr.msk.bf16.gmra.mxu1 %vm523_vm0, %v2707_v55 }
 0x1d3   : > { %1275 = vmatpush1.bf16.msra.mxu0 %v3186_v32  ;;  %1348 = vmatpush1.bf16.msra.mxu1 %v3187_v5  ;;  %v2797_v5 = vpop.permute.xlu1 %755 }
 0x1d4   : > { %1276 = vmatprep.subr.bf16.mxu0 %v3188_v11  ;;  %1349 = vmatprep.subr.bf16.mxu1 %v3189_v38  ;;  %3203 = vst [vmem:[#allocation20_spill] sm:$0xff] %v2797_v5 }
 0x1d5   : > { %846 = vmatprep.mubr.bf16.mxu0 %v3169_v6  ;;  %919 = vmatprep.mubr.bf16.mxu1 %v3169_v6 }
 0x1d7   : > { %1277 = vmatpush1.bf16.msra.mxu0 %v3190_v48  ;;  %1350 = vmatpush1.bf16.msra.mxu1 %v3191_v8 }
 0x1da   : > { %1862 = vmatmul.mubr.msk.bf16.gmra.mxu0 %vm523_vm0, %v2723_v50  ;;  %1866 = vmatmul.mubr.msk.bf16.gmra.mxu1 %vm523_vm0, %v2723_v50 }
 0x1db   : > { %856 = vmatprep.mubr.bf16.mxu0 %v3169_v6  ;;  %929 = vmatprep.mubr.bf16.mxu1 %v3169_v6 }
 0x1e2   : > { %1863 = vmatmul.mubr.msk.bf16.gmra.mxu0 %vm523_vm0, %v2733_v34  ;;  %1867 = vmatmul.mubr.msk.bf16.gmra.mxu1 %vm523_vm0, %v2733_v34 }
 0x1e3   : > { %1294 = vmatprep.mubr.bf16.mxu0 %v3169_v6  ;;  %1367 = vmatprep.mubr.bf16.mxu1 %v3169_v6 }
 0x1ea   : > { %1869 = vmatmul.mubr.msk.bf16.vlgmr.msra.gmra.mxu0 %vm523_vm0, %v3192_v35  ;;  %1873 = vmatmul.mubr.msk.bf16.vlgmr.msra.gmra.mxu1 %vm523_vm0, %v3192_v35 }
 0x1eb   : > { %1304 = vmatprep.mubr.bf16.mxu0 %v3169_v6  ;;  %1377 = vmatprep.mubr.bf16.mxu1 %v3169_v6 }
 0x1f2   : > { %1870 = vmatmul.mubr.msk.bf16.gmra.mxu0 %vm523_vm0, %v3193_v28  ;;  %1874 = vmatmul.mubr.msk.bf16.gmra.mxu1 %vm523_vm0, %v3193_v28 }
 0x1f3   : > { %1314 = vmatprep.mubr.bf16.mxu0 %v3169_v6  ;;  %1387 = vmatprep.mubr.bf16.mxu1 %v3169_v6 }
 0x1fa   : > { %1871 = vmatmul.mubr.msk.bf16.gmra.mxu0 %vm523_vm0, %v3194_v60  ;;  %1875 = vmatmul.mubr.msk.bf16.gmra.mxu1 %vm523_vm0, %v3194_v60 }
 0x1fb   : > { %1324 = vmatprep.mubr.bf16.mxu0 %v3169_v6  ;;  %1397 = vmatprep.mubr.bf16.mxu1 %v3169_v6 }
 0x202   : > { %1872 = vmatmul.mubr.msk.bf16.gmra.mxu0 %vm523_vm0, %v3195_v63  ;;  %1876 = vmatmul.mubr.msk.bf16.gmra.mxu1 %vm523_vm0, %v3195_v63 }
 0x203   : > { %1488 = vmatprep.mubr.bf16.mxu0 %v3169_v6  ;;  %1561 = vmatprep.mubr.bf16.mxu1 %v3169_v6 }
 0x28a   : > { %v828_v40 = vpop.f32.mrf.mxu0  ;;  %v901_v42 = vpop.f32.mrf.mxu1 }
 0x28b   : > { %v829_v31 = vadd.f32 %v828_v40, %v2775_v56  ;;  %v902_v29 = vadd.f32 %v901_v42, %v2775_v56 }
 0x28c   : > { %v830_v25 = vpop.f32.mrf.mxu0  ;;  %v903_v7 = vpop.f32.mrf.mxu1 }
 0x28d   : > { %v831_v12 = vadd.f32 %v830_v25, %v2775_v56  ;;  %v904_v23 = vadd.f32 %v903_v7, %v2775_v56  ;;  %v940_v0 = vmax.f32 %v829_v31, 0.0  ;;  %v942_v52 = vmax.f32 %v902_v29, 0.0  ;;  %v2806_v25 = vpop.permute.xlu0 %751 }
 0x28e   : > { %v832_v54 = vpop.f32.mrf.mxu0  ;;  %v905_v58 = vpop.f32.mrf.mxu1  ;;  %3204 = vst [vmem:[#allocation10_spill] sm:$0xff] %v2806_v25 }
 0x28f   : > { %v833_v30 = vadd.f32 %v832_v54, %v2765_v24  ;;  %v906_v9 = vadd.f32 %v905_v58, %v2765_v24  ;;  %v941_v21 = vmax.f32 %v831_v12, 0.0  ;;  %v943_v1 = vmax.f32 %v904_v23, 0.0 }
 0x290   : > { %v834_v37 = vpop.f32.mrf.mxu0  ;;  %v907_v4 = vpop.f32.mrf.mxu1  ;;  %v1004_v36 = vmul.f32 %v2769_v16, %v940_v0  ;;  %v1006_v57 = vmul.f32 %v2769_v16, %v942_v52 }
 0x291   : > { %v944_v61 = vmax.f32 %v833_v30, 0.0  ;;  %v835_v17 = vadd.f32 %v834_v37, %v2765_v24  ;;  %v946_v39 = vmax.f32 %v906_v9, 0.0  ;;  %v908_v19 = vadd.f32 %v907_v4, %v2765_v24 }
 0x292   : > { %v838_v10 = vpop.f32.mrf.mxu0  ;;  %v911_v27 = vpop.f32.mrf.mxu1  ;;  %v1005_v11 = vmul.f32 %v2769_v16, %v941_v21  ;;  %v1007_v60 = vmul.f32 %v2769_v16, %v943_v1 }
 0x293   : > { %v1008_v59 = vmul.f32 %v2771_v15, %v944_v61  ;;  %v945_v46 = vmax.f32 %v835_v17, 0.0  ;;  %v839_v26 = vadd.f32 %v838_v10, %v2767_v22  ;;  %v912_v2 = vadd.f32 %v911_v27, %v2767_v22  ;;  %v2816_v27 = vpop.permute.xlu1 %759 }
 0x294   : > { %v947_v33 = vmax.f32 %v908_v19, 0.0  ;;  %v840_v49 = vpop.f32.mrf.mxu0  ;;  %v913_v20 = vpop.f32.mrf.mxu1  ;;  %v1010_v62 = vmul.f32 %v2771_v15, %v946_v39  ;;  %3205 = vst [vmem:[#allocation13_spill] sm:$0xff] %v2816_v27 }
 0x295   : > { %v948_v45 = vmax.f32 %v839_v26, 0.0  ;;  %v950_v32 = vmax.f32 %v912_v2, 0.0  ;;  %v1009_v38 = vmul.f32 %v2771_v15, %v945_v46  ;;  %v841_v48 = vadd.f32 %v840_v49, %v2767_v22 }
 0x296   : > { %v914_v8 = vadd.f32 %v913_v20, %v2767_v22  ;;  %v842_v35 = vpop.f32.mrf.mxu0  ;;  %v915_v28 = vpop.f32.mrf.mxu1  ;;  %v1036_v63 = vadd.f32 %v1008_v59, %v1004_v36  ;;  %v1011_v40 = vmul.f32 %v2771_v15, %v947_v33  ;;  %v1062_v58 = vadd.f32 %v1010_v62, %v1006_v57 }
 0x297   : > { %v843_v42 = vadd.f32 %v842_v35, %v2788_v18  ;;  %v1012_v7 = vmul.f32 %v2777_v41, %v948_v45  ;;  %v949_v31 = vmax.f32 %v841_v48, 0.0  ;;  %v916_v12 = vadd.f32 %v915_v28, %v2788_v18  ;;  %v2822_v45 = vpop.permute.xlu0 %989 }
 0x298   : > { %v951_v29 = vmax.f32 %v914_v8, 0.0  ;;  %v844_v23 = vpop.f32.mrf.mxu0  ;;  %v917_v54 = vpop.f32.mrf.mxu1  ;;  %v1014_v30 = vmul.f32 %v2777_v41, %v950_v32  ;;  %v1049_v37 = vadd.f32 %v1009_v38, %v1005_v11  ;;  %v1075_v1 = vadd.f32 %v1011_v40, %v1007_v60  ;;  %3206 = vst [vmem:[#allocation18_spill] sm:$0xff] %v2822_v45 }
 0x299   : > { %v952_v0 = vmax.f32 %v843_v42, 0.0  ;;  %v845_v9 = vadd.f32 %v844_v23, %v2788_v18  ;;  %v1013_v4 = vmul.f32 %v2777_v41, %v949_v31  ;;  %v954_v61 = vmax.f32 %v916_v12, 0.0 }
 0x29a   : > { %v918_v52 = vadd.f32 %v917_v54, %v2788_v18  ;;  %v848_v17 = vpop.f32.mrf.mxu0  ;;  %v921_v21 = vpop.f32.mrf.mxu1  ;;  %v1037_v59 = vadd.f32 %v1036_v63, %v1012_v7  ;;  %v1015_v46 = vmul.f32 %v2777_v41, %v951_v29  ;;  %v1063_v49 = vadd.f32 %v1062_v58, %v1014_v30 }
 0x29b   : > { %v953_v39 = vmax.f32 %v845_v9, 0.0  ;;  %v849_v19 = vadd.f32 %v848_v17, %v2773_v3  ;;  %v922_v10 = vadd.f32 %v921_v21, %v2773_v3  ;;  %v1016_v26 = vmul.f32 %v2784_v51, %v952_v0  ;;  %v2831_v0 = vpop.permute.xlu1 %993 }
 0x29c   : > { %v955_v2 = vmax.f32 %v918_v52, 0.0  ;;  %v850_v36 = vpop.f32.mrf.mxu0  ;;  %v923_v33 = vpop.f32.mrf.mxu1  ;;  %v1018_v20 = vmul.f32 %v2784_v51, %v954_v61  ;;  %v1050_v32 = vadd.f32 %v1049_v37, %v1013_v4  ;;  %v1076_v42 = vadd.f32 %v1075_v1, %v1015_v46  ;;  %3207 = vst [vmem:[#allocation21_spill] sm:$0xff] %v2831_v0 }
 0x29d   : > { %v956_v57 = vmax.f32 %v849_v19, 0.0  ;;  %v851_v62 = vadd.f32 %v850_v36, %v2773_v3  ;;  %v1017_v11 = vmul.f32 %v2784_v51, %v953_v39  ;;  %v958_v38 = vmax.f32 %v922_v10, 0.0 }
 0x29e   : > { %v924_v48 = vadd.f32 %v923_v33, %v2773_v3  ;;  %v852_v8 = vpop.f32.mrf.mxu0  ;;  %v925_v35 = vpop.f32.mrf.mxu1  ;;  %v1019_v28 = vmul.f32 %v2784_v51, %v955_v2  ;;  %v1038_v23 = vadd.f32 %v1037_v59, %v1016_v26  ;;  %v1064_v9 = vadd.f32 %v1063_v49, %v1018_v20 }
 0x29f   : > { %v957_v60 = vmax.f32 %v851_v62, 0.0  ;;  %v853_v63 = vadd.f32 %v852_v8, %v2806_v25  ;;  %v926_v40 = vadd.f32 %v925_v35, %v2806_v25  ;;  %v1020_v31 = vmul.f32 %v2822_v45, %v956_v57 }
 0x2a0   : > { %v959_v7 = vmax.f32 %v924_v48, 0.0  ;;  %v854_v29 = vpop.f32.mrf.mxu0  ;;  %v927_v12 = vpop.f32.mrf.mxu1  ;;  %v1022_v4 = vmul.f32 %v2822_v45, %v958_v38  ;;  %v1051_v1 = vadd.f32 %v1050_v32, %v1017_v11  ;;  %v1077_v39 = vadd.f32 %v1076_v42, %v1019_v28 }
 0x2a1   : > { %v960_v54 = vmax.f32 %v853_v63, 0.0  ;;  %v962_v58 = vmax.f32 %v926_v40, 0.0  ;;  %v855_v30 = vadd.f32 %v854_v29, %v2806_v25  ;;  %v1021_v37 = vmul.f32 %v2822_v45, %v957_v60  ;;  %v2843_v32 = vpop.permute.xlu0 %997 }
 0x2a2   : > { %v1023_v61 = vmul.f32 %v2822_v45, %v959_v7  ;;  %v928_v52 = vadd.f32 %v927_v12, %v2806_v25  ;;  %v858_v17 = vpop.f32.mrf.mxu0  ;;  %v931_v21 = vpop.f32.mrf.mxu1  ;;  %v1039_v10 = vadd.f32 %v1038_v23, %v1020_v31  ;;  %3208 = vst [vmem:[#allocation25_spill] sm:$0xff] %v2843_v32  ;;  %v1065_v35 = vadd.f32 %v1064_v9, %v1022_v4 }
 0x2a3   : > { %v859_v19 = vadd.f32 %v858_v17, %v2797_v5  ;;  %v961_v59 = vmax.f32 %v855_v30, 0.0  ;;  %v1024_v26 = vmul.f32 %v2831_v0, %v960_v54  ;;  %v932_v2 = vadd.f32 %v931_v21, %v2797_v5  ;;  %v2847_v7 = vpop.permute.xlu1 %1001 }
 0x2a4   : > { %v963_v46 = vmax.f32 %v928_v52, 0.0  ;;  %v860_v36 = vpop.f32.mrf.mxu0  ;;  %v933_v33 = vpop.f32.mrf.mxu1  ;;  %v1026_v49 = vmul.f32 %v2831_v0, %v962_v58  ;;  %v1052_v8 = vadd.f32 %v1051_v1, %v1021_v37  ;;  %v1078_v28 = vadd.f32 %v1077_v39, %v1023_v61  ;;  %3209 = vst [vmem:[#allocation26_spill] sm:$0xff] %v2847_v7 }
 0x2a5   : > { %v964_v20 = vmax.f32 %v859_v19, 0.0  ;;  %v861_v57 = vadd.f32 %v860_v36, %v2797_v5  ;;  %v934_v62 = vadd.f32 %v933_v33, %v2797_v5  ;;  %v966_v11 = vmax.f32 %v932_v2, 0.0 }
 0x2a6   : > { %v862_v38 = vpop.f32.mrf.mxu0  ;;  %v935_v48 = vpop.f32.mrf.mxu1  ;;  %v1025_v31 = vmul.f32 %v2831_v0, %v961_v59  ;;  %v1027_v29 = vmul.f32 %v2831_v0, %v963_v46  ;;  %v1040_v37 = vadd.f32 %v1039_v10, %v1024_v26  ;;  %v1066_v4 = vadd.f32 %v1065_v35, %v1026_v49 }
 0x2a7   : > { %v965_v60 = vmax.f32 %v861_v57, 0.0  ;;  %v967_v63 = vmax.f32 %v934_v62, 0.0  ;;  %v863_v40 = vadd.f32 %v862_v38, %v2816_v27  ;;  %v936_v42 = vadd.f32 %v935_v48, %v2816_v27 }
 0x2a8   : > { %v1028_v12 = vmul.f32 %v2843_v32, %v964_v20  ;;  %v1030_v23 = vmul.f32 %v2843_v32, %v966_v11  ;;  %v864_v54 = vpop.f32.mrf.mxu0  ;;  %v937_v58 = vpop.f32.mrf.mxu1  ;;  %v1053_v10 = vadd.f32 %v1052_v8, %v1025_v31  ;;  %v1079_v26 = vadd.f32 %v1078_v28, %v1027_v29 }
 0x2a9   : > { %v968_v30 = vmax.f32 %v863_v40, 0.0  ;;  %v970_v9 = vmax.f32 %v936_v42, 0.0  ;;  %v1029_v61 = vmul.f32 %v2843_v32, %v965_v60  ;;  %v1031_v52 = vmul.f32 %v2843_v32, %v967_v63 }
 0x2aa   : > { %v865_v17 = vadd.f32 %v864_v54, %v2816_v27  ;;  %v938_v21 = vadd.f32 %v937_v58, %v2816_v27  ;;  %v2857_v1 = vpop.f32.mrf.mxu0  ;;  %v2859_v39 = vpop.f32.mrf.mxu1  ;;  %v1041_v19 = vadd.f32 %v1040_v37, %v1028_v12  ;;  %v1067_v59 = vadd.f32 %v1066_v4, %v1030_v23  ;;  %v3211_v27 = vld [vmem:[#allocation9_spill] sm:$0xff] }
 0x2ab   : > { %v1032_v46 = vmul.f32 %v2847_v7, %v968_v30  ;;  %v1034_v2 = vmul.f32 %v2847_v7, %v970_v9  ;;  %v1054_v11 = vadd.f32 %v1053_v10, %v1029_v61  ;;  %v1080_v38 = vadd.f32 %v1079_v26, %v1031_v52 }
 0x2ac   : > { %v969_v36 = vmax.f32 %v865_v17, 0.0  ;;  %v971_v33 = vmax.f32 %v938_v21, 0.0  ;;  %v2863_v49 = vpop.f32.mrf.mxu0  ;;  %v2865_v20 = vpop.f32.mrf.mxu1 }
 0x2ad   : > { %v1042_v57 = vadd.f32 %v1041_v19, %v1032_v46  ;;  %v1068_v62 = vadd.f32 %v1067_v59, %v1034_v2 }
 0x2ae   : > { %v1033_v48 = vmul.f32 %v2847_v7, %v969_v36  ;;  %v1035_v35 = vmul.f32 %v2847_v7, %v971_v33  ;;  %v2869_v60 = vpop.f32.mrf.mxu0  ;;  %v2871_v63 = vpop.f32.mrf.mxu1 }
 0x2af   : > { %v1043_v8 = vrot.slane %v1042_v57, 4  ;;  %v1069_v28 = vrot.slane %v1068_v62, 4 }
 0x2b0   : > { %v1055_v40 = vadd.f32 %v1054_v11, %v1033_v48  ;;  %v1081_v42 = vadd.f32 %v1080_v38, %v1035_v35  ;;  %v1302_v31 = vpop.f32.mrf.mxu0  ;;  %v1375_v29 = vpop.f32.mrf.mxu1  ;;  %v2080_v38 = vmov 1966171168  }
 0x2b1   : > { %v1044_v12 = vadd.f32 %v1043_v8, %v1042_v57  ;;  %v1070_v23 = vadd.f32 %v1069_v28, %v1068_v62  ;;  %v1100_v48 = vunpack.c.l.s4 %v2080_v38 }
 0x2b2   : > { %v1056_v54 = vrot.slane %v1055_v40, 4  ;;  %v1082_v58 = vrot.slane %v1081_v42, 4  ;;  %v2873_v30 = vpop.f32.mrf.mxu0  ;;  %v2875_v9 = vpop.f32.mrf.mxu1 }
 0x2b3   : > { %v1045_v37 = vrot.slane %v1044_v12, 2  ;;  %v1071_v4 = vrot.slane %v1070_v23, 2 }
 0x2b4   : > { %v1057_v61 = vadd.f32 %v1056_v54, %v1055_v40  ;;  %v1083_v52 = vadd.f32 %v1082_v58, %v1081_v42  ;;  %v1308_v17 = vpop.f32.mrf.mxu0  ;;  %v1381_v21 = vpop.f32.mrf.mxu1 }
 0x2b5   : > { %v1046_v19 = vadd.f32 %v1045_v37, %v1044_v12  ;;  %v1072_v46 = vadd.f32 %v1071_v4, %v1070_v23  ;;  %v1101_v37 = vunpack.c.0.s8 %v1100_v48  ;;  %v2881_v4 = vstv %s248_s8 }
 0x2b6   : > { %v1058_v59 = vrot.slane %v1057_v61, 2  ;;  %v1084_v2 = vrot.slane %v1083_v52, 2  ;;  %v1310_v10 = vpop.f32.mrf.mxu0  ;;  %v1383_v26 = vpop.f32.mrf.mxu1  ;;  %3210 = vst [vmem:[#allocation27_spill] sm:$0xff] %v2881_v4 }
 0x2b7   : > { %v1047_v36 = vrot.slane %v1046_v19, 1  ;;  %v1073_v8 = vrot.slane %v1072_v46, 1  ;;  %v2884_v32 = vsub.s32 %v1101_v37, %v3211_v27  ;;  %v2914_v37 = vadd.f32 %v1381_v21, %v2617_v47 }
 0x2b8   : > { %v1059_v33 = vadd.f32 %v1058_v59, %v1057_v61  ;;  %v1085_v57 = vadd.f32 %v1084_v2, %v1083_v52  ;;  %v1312_v62 = vpop.f32.mrf.mxu0  ;;  %v1385_v11 = vpop.f32.mrf.mxu1 }
 0x2b9   : > { %v1048_v12 = vadd.f32 %v1047_v36, %v1046_v19  ;;  %v1074_v61 = vadd.f32 %v1073_v8, %v1072_v46  ;;  %v3212_v36 = vlaneseq  ;;  %v2895_v46 = vadd.f32 %v2863_v49, %v2621_v43 }
 0x2ba   : > { %v1060_v35 = vrot.slane %v1059_v33, 1  ;;  %v1086_v28 = vrot.slane %v1085_v57, 1  ;;  %v2877_v40 = vpop.f32.mrf.mxu0  ;;  %v2879_v42 = vpop.f32.mrf.mxu1  ;;  %v2910_v49 = vadd.f32 %v1308_v17, %v2617_v47 }
 0x2bb   : > { %v1089_v0 = vadd.f32 %v2881_v4, %v1048_v12  ;;  %vm2889_vm1 = vcmp.lt.s32.totalorder %v3212_v36, 512  ;;  %v2904_v12 = vadd.f32 %v1302_v31, %v2623_v44 }
 0x2bc   : > { %v1061_v54 = vadd.f32 %v1060_v35, %v1059_v33  ;;  %v1318_v23 = vpop.f32.mrf.mxu0  ;;  %v1391_v58 = vpop.f32.mrf.mxu1  ;;  %v1087_v52 = vadd.f32 %v1086_v28, %v1085_v57  ;;  %v1091_v35 = vadd.f32 %v2881_v4, %v1074_v61  ;;  %v2901_v28 = vadd.f32 %v2865_v20, %v2621_v43  ;;  %v3215_v61 = vld [vmem:[#allocation24_spill] sm:$0xff] }
 0x2bd   : > { %v2921_v36 = vadd.f32 %v1383_v26, %v3215_v61  ;;  %v2927_v17 = vadd.f32 %v1385_v11, %v3215_v61  ;;  %v1319_v5 = vadd.f32 %v1318_v23, %v2604_v53 }
 0x2be   : > { %v1320_v59 = vpop.f32.mrf.mxu0  ;;  %v1393_v2 = vpop.f32.mrf.mxu1  ;;  %v1090_v19 = vadd.f32 %v2881_v4, %v1061_v54  ;;  %v1092_v27 = vadd.f32 %v2881_v4, %v1087_v52  ;;  %v2907_v54 = vadd.f32 %v1375_v29, %v2623_v44  ;;  %v2924_v29 = vadd.f32 %v1312_v62, %v3215_v61  ;;  %v3216_v4 = vld [vmem:[#allocation23_spill] sm:$0xff] }
 0x2bf   : > { %v1321_v23 = vadd.f32 %v1320_v59, %v3216_v4  ;;  %v1394_v18 = vadd.f32 %v1393_v2, %v3216_v4 }
 0x2c0   : > { %v1322_v7 = vpop.f32.mrf.mxu0  ;;  %v1395_v38 = vpop.f32.mrf.mxu1  ;;  %v1097_v8 = vcombine.low %v1089_v0, %v1090_v19  ;;  %v2917_v0 = vadd.f32 %v1310_v10, %v3215_v61  ;;  %v1098_v19 = vcombine.low %v1091_v35, %v1092_v27  ;;  %v1392_v10 = vadd.f32 %v1391_v58, %v2604_v53 }
 0x2c1   : > { %v1323_v21 = vadd.f32 %v1322_v7, %v3216_v4  ;;  %v1396_v25 = vadd.f32 %v1395_v38, %v3216_v4  ;;  %v1390_v4 = vadd.f32 %v2879_v42, %v2604_v53 }
 0x2c2   : > { %v1326_v57 = vpop.f32.mrf.mxu0  ;;  %v1399_v48 = vpop.f32.mrf.mxu1  ;;  %v1105_v31 = vrot.slane %v1097_v8, %v2884_v32  ;;  %v1112_v26 = vrot.slane %v1098_v19, %v2884_v32  ;;  %v3217_v8 = vld [vmem:[#allocation22_spill] sm:$0xff] }
 0x2c3   : > { %v1327_v58 = vadd.f32 %v1326_v57, %v3217_v8  ;;  %v1400_v38 = vadd.f32 %v1399_v48, %v3217_v8  ;;  %v1429_v19 = vmax.f32 %v1323_v21, 0.0  ;;  %v1431_v41 = vmax.f32 %v1396_v25, 0.0 }
 0x2c4   : > { %v1328_v52 = vpop.f32.mrf.mxu0  ;;  %v1401_v20 = vpop.f32.mrf.mxu1  ;;  %v1113_v3 = vcombine.low %v1105_v31, %v1112_v26  ;;  %v1317_v48 = vadd.f32 %v2877_v40, %v2604_v53  ;;  %v1430_v21 = vmax.f32 %v1394_v18, 0.0  ;;  %v1421_v40 = vmax.f32 %v2924_v29, 0.0 }
 0x2c5   : > { %v1329_v62 = vadd.f32 %v1328_v52, %v3217_v8  ;;  %v1402_v45 = vadd.f32 %v1401_v20, %v3217_v8  ;;  %v1432_v2 = vmax.f32 %v1327_v58, 0.0  ;;  %v1434_v31 = vmax.f32 %v1400_v38, 0.0 }
 0x2c6   : > { %v1330_v35 = vpop.f32.mrf.mxu0  ;;  %v1403_v27 = vpop.f32.mrf.mxu1  ;;  %v1423_v53 = vmax.f32 %v2927_v17, 0.0  ;;  %v1419_v18 = vmax.f32 %v2914_v37, 0.0  ;;  %v1413_v17 = vmax.f32 %v2904_v12, 0.0 }
 0x2c7   : > { %v1331_v11 = vadd.f32 %v1330_v35, %v2612_v14  ;;  %v1404_v7 = vadd.f32 %v1403_v27, %v2612_v14  ;;  %v1120_v27 = vrot.slane %v1113_v3, %v2884_v32  ;;  %v1433_v59 = vmax.f32 %v1329_v62, 0.0 }
 0x2c8   : > { %v1332_v61 = vpop.f32.mrf.mxu0  ;;  %v1405_v51 = vpop.f32.mrf.mxu1  ;;  %v1435_v16 = vmax.f32 %v1402_v45, 0.0  ;;  %v1427_v3 = vmax.f32 %v1392_v10, 0.0  ;;  %v1428_v45 = vmax.f32 %v1321_v23, 0.0  ;;  %v1424_v10 = vmax.f32 %v1317_v48, 0.0 }
 0x2c9   : > { %v1333_v52 = vadd.f32 %v1332_v61, %v2612_v14  ;;  %v1406_v20 = vadd.f32 %v1405_v51, %v2612_v14  ;;  %v1436_v35 = vmax.f32 %v1331_v11, 0.0  ;;  %v1438_v15 = vmax.f32 %v1404_v7, 0.0  ;;  %1126 = vst.msk [vmem:[%s2951_s11] sm:$0xf] %vm2889_vm1, %v1120_v27 }
 0x2ca   : > { %v1425_v14 = vmax.f32 %v1319_v5, 0.0  ;;  %v1451_v62 = vpack.c.bf16 %v1431_v41, %v1427_v3  ;;  %v1307_v11 = vadd.f32 %v2873_v30, %v2617_v47  ;;  %v1380_v5 = vadd.f32 %v2875_v9, %v2617_v47 }
 0x2cb   : > { %v1437_v57 = vmax.f32 %v1333_v52, 0.0  ;;  %v1439_v22 = vmax.f32 %v1406_v20, 0.0  ;;  %v1452_v26 = vpack.c.bf16 %v1436_v35, %v1432_v2  ;;  %v1454_v8 = vpack.c.bf16 %v1438_v15, %v1434_v31 }
 0x2cc   : > { %v1449_v42 = vpack.c.bf16 %v1429_v19, %v1425_v14  ;;  %v1374_v15 = vadd.f32 %v2871_v63, %v2623_v44  ;;  %v1417_v41 = vmax.f32 %v2910_v49, 0.0  ;;  %v1420_v30 = vmax.f32 %v2917_v0, 0.0 }
 0x2cd   : > { %v1453_v51 = vpack.c.bf16 %v1437_v57, %v1433_v59  ;;  %v1455_v25 = vpack.c.bf16 %v1439_v22, %v1435_v16  ;;  %v1426_v22 = vmax.f32 %v1390_v4, 0.0  ;;  %v1301_v16 = vadd.f32 %v2869_v60, %v2623_v44 }
 0x2ce   : > { %v1422_v47 = vmax.f32 %v2921_v36, 0.0  ;;  %v1448_v9 = vpack.c.bf16 %v1428_v45, %v1424_v10  ;;  %v1415_v7 = vmax.f32 %v2907_v54, 0.0  ;;  %v1445_v60 = vpack.c.bf16 %v1421_v40, %v1417_v41 }
 0x2cf   : > { %1464 = vmatprep.subr.bf16.mxu0 %v1453_v51  ;;  %1537 = vmatprep.subr.bf16.mxu1 %v1455_v25  ;;  %v1450_v29 = vpack.c.bf16 %v1430_v21, %v1426_v22  ;;  %v1447_v23 = vpack.c.bf16 %v1423_v53, %v1419_v18  ;;  %v1297_v44 = vadd.f32 %v2857_v1, %v2621_v43  ;;  %v1416_v49 = vmax.f32 %v1307_v11, 0.0  ;;  %v3218_v53 = vld [vmem:[#allocation11_spill] sm:$0xff]  ;;  %v3219_v11 = vld [vmem:[#allocation12_spill] sm:$0xff] }
 0x2d0   : > { %1465 = vmatpush1.bf16.msra.mxu0 %v1452_v26  ;;  %1538 = vmatpush1.bf16.msra.mxu1 %v1454_v8  ;;  %v1370_v63 = vadd.f32 %v2859_v39, %v2621_v43  ;;  %v1418_v37 = vmax.f32 %v1380_v5, 0.0  ;;  %v1409_v0 = vmax.f32 %v2895_v46, 0.0  ;;  %v1411_v36 = vmax.f32 %v2901_v28, 0.0 }
 0x2d1   : > { %1466 = vmatprep.subr.bf16.mxu0 %v1449_v42  ;;  %1539 = vmatprep.subr.bf16.mxu1 %v1451_v62  ;;  %v1412_v12 = vmax.f32 %v1301_v16, 0.0  ;;  %v1414_v54 = vmax.f32 %v1374_v15, 0.0  ;;  %v1444_v58 = vpack.c.bf16 %v1420_v30, %v1416_v49  ;;  %v1408_v1 = vmax.f32 %v1297_v44, 0.0  ;;  %v3220_v15 = vld [vmem:[#allocation14_spill] sm:$0xff] }
 0x2d2   : > { %v1446_v38 = vpack.c.bf16 %v1422_v47, %v1418_v37  ;;  %v1441_v61 = vpack.c.bf16 %v1413_v17, %v1409_v0  ;;  %v1443_v19 = vpack.c.bf16 %v1415_v7, %v1411_v36  ;;  %v1410_v52 = vmax.f32 %v1370_v63, 0.0  ;;  %v3221_v63 = vld [vmem:[#allocation16_spill] sm:$0xff] }
 0x2d3   : > { %v1440_v43 = vpack.c.bf16 %v1412_v12, %v1408_v1  ;;  %v3222_v12 = vld [vmem:[#allocation19_spill] sm:$0xff] }
 0x2d4   : > { %1467 = vmatpush1.bf16.msra.mxu0 %v1448_v9  ;;  %1540 = vmatpush1.bf16.msra.mxu1 %v1450_v29  ;;  %v1442_v39 = vpack.c.bf16 %v1414_v54, %v1410_v52 }
 0x2d5   : > { %1468 = vmatprep.subr.bf16.mxu0 %v1445_v60  ;;  %1541 = vmatprep.subr.bf16.mxu1 %v1447_v23 }
 0x2d8   : > { %1469 = vmatpush1.bf16.msra.mxu0 %v1444_v58  ;;  %1542 = vmatpush1.bf16.msra.mxu1 %v1446_v38 }
 0x2d9   : > { %1470 = vmatprep.subr.bf16.mxu0 %v1441_v61  ;;  %1543 = vmatprep.subr.bf16.mxu1 %v1443_v19 }
 0x2dc   : > { %1471 = vmatpush1.bf16.msra.mxu0 %v1440_v43  ;;  %1544 = vmatpush1.bf16.msra.mxu1 %v1442_v39 }
 0x2df   : > { %1877 = vmatmul.mubr.msk.bf16.vlgmr.msra.gmra.mxu0 %vm523_vm0, %v2693_v13  ;;  %1881 = vmatmul.mubr.msk.bf16.vlgmr.msra.gmra.mxu1 %vm523_vm0, %v2693_v13 }
 0x2e0   : > { %1498 = vmatprep.mubr.bf16.mxu0 %v3169_v6  ;;  %1571 = vmatprep.mubr.bf16.mxu1 %v3169_v6 }
 0x2e7   : > { %1878 = vmatmul.mubr.msk.bf16.gmra.mxu0 %vm523_vm0, %v2707_v55  ;;  %1882 = vmatmul.mubr.msk.bf16.gmra.mxu1 %vm523_vm0, %v2707_v55 }
 0x2e8   : > { %1508 = vmatprep.mubr.bf16.mxu0 %v3169_v6  ;;  %1581 = vmatprep.mubr.bf16.mxu1 %v3169_v6 }
 0x2ef   : > { %1879 = vmatmul.mubr.msk.bf16.gmra.mxu0 %vm523_vm0, %v2723_v50  ;;  %1883 = vmatmul.mubr.msk.bf16.gmra.mxu1 %vm523_vm0, %v2723_v50 }
 0x2f0   : > { %1518 = vmatprep.mubr.bf16.mxu0 %v3169_v6  ;;  %1591 = vmatprep.mubr.bf16.mxu1 %v3169_v6 }
 0x2f7   : > { %1880 = vmatmul.mubr.msk.bf16.gmra.mxu0 %vm523_vm0, %v2733_v34  ;;  %1884 = vmatmul.mubr.msk.bf16.gmra.mxu1 %vm523_vm0, %v2733_v34 }
 0x39f   : > { %v1490_v13 = vpop.f32.mrf.mxu0  ;;  %v1563_v55 = vpop.f32.mrf.mxu1 }
 0x3a0   : > { %v1491_v46 = vadd.f32 %v1490_v13, %v2775_v56  ;;  %v1564_v28 = vadd.f32 %v1563_v55, %v2775_v56 }
 0x3a1   : > { %v1492_v20 = vpop.f32.mrf.mxu0  ;;  %v1565_v35 = vpop.f32.mrf.mxu1 }
 0x3a2   : > { %v1493_v50 = vadd.f32 %v1492_v20, %v2775_v56  ;;  %v1566_v27 = vadd.f32 %v1565_v35, %v2775_v56  ;;  %v1602_v57 = vmax.f32 %v1491_v46, 0.0  ;;  %v1604_v48 = vmax.f32 %v1564_v28, 0.0 }
 0x3a3   : > { %v1494_v59 = vpop.f32.mrf.mxu0  ;;  %v1567_v6 = vpop.f32.mrf.mxu1 }
 0x3a4   : > { %v1495_v4 = vadd.f32 %v1494_v59, %v2765_v24  ;;  %v1568_v34 = vadd.f32 %v1567_v6, %v2765_v24  ;;  %v1603_v51 = vmax.f32 %v1493_v50, 0.0  ;;  %v1605_v25 = vmax.f32 %v1566_v27, 0.0  ;;  %v3223_v27 = vld [vmem:[#allocation15_spill] sm:$0xff] }
 0x3a5   : > { %v1496_v2 = vpop.f32.mrf.mxu0  ;;  %v1569_v31 = vpop.f32.mrf.mxu1  ;;  %v1634_v5 = vmul.f32 %v1602_v57, %v3219_v11  ;;  %v1636_v10 = vmul.f32 %v1604_v48, %v3219_v11 }
 0x3a6   : > { %v1497_v14 = vadd.f32 %v1496_v2, %v2765_v24  ;;  %v1570_v3 = vadd.f32 %v1569_v31, %v2765_v24  ;;  %v1606_v45 = vmax.f32 %v1495_v4, 0.0  ;;  %v1608_v21 = vmax.f32 %v1568_v34, 0.0 }
 0x3a7   : > { %v1500_v26 = vpop.f32.mrf.mxu0  ;;  %v1573_v56 = vpop.f32.mrf.mxu1  ;;  %v1635_v47 = vmul.f32 %v1603_v51, %v3219_v11  ;;  %v1637_v9 = vmul.f32 %v1605_v25, %v3219_v11  ;;  %v3225_v11 = vld [vmem:[#allocation18_spill] sm:$0xff] }
 0x3a8   : > { %v1607_v8 = vmax.f32 %v1497_v14, 0.0  ;;  %v1609_v40 = vmax.f32 %v1570_v3, 0.0  ;;  %v1501_v42 = vadd.f32 %v1500_v26, %v3218_v53  ;;  %v1574_v62 = vadd.f32 %v1573_v56, %v3218_v53  ;;  %v3224_v14 = vld [vmem:[#allocation17_spill] sm:$0xff] }
 0x3a9   : > { %v1502_v22 = vpop.f32.mrf.mxu0  ;;  %v1575_v16 = vpop.f32.mrf.mxu1  ;;  %v1638_v24 = vmul.f32 %v1606_v45, %v3220_v15  ;;  %v1640_v41 = vmul.f32 %v1608_v21, %v3220_v15 }
 0x3aa   : > { %v1610_v18 = vmax.f32 %v1501_v42, 0.0  ;;  %v1612_v30 = vmax.f32 %v1574_v62, 0.0  ;;  %v1503_v29 = vadd.f32 %v1502_v22, %v3218_v53  ;;  %v1576_v17 = vadd.f32 %v1575_v16, %v3218_v53 }
 0x3ab   : > { %v1504_v7 = vpop.f32.mrf.mxu0  ;;  %v1577_v60 = vpop.f32.mrf.mxu1  ;;  %v1639_v23 = vmul.f32 %v1607_v8, %v3220_v15  ;;  %v1641_v44 = vmul.f32 %v1609_v40, %v3220_v15  ;;  %v1666_v19 = vadd.f32 %v1638_v24, %v1634_v5  ;;  %v1692_v1 = vadd.f32 %v1640_v41, %v1636_v10  ;;  %v3226_v15 = vld [vmem:[#allocation10_spill] sm:$0xff] }
 0x3ac   : > { %v1642_v49 = vmul.f32 %v1610_v18, %v3221_v63  ;;  %v1644_v37 = vmul.f32 %v1612_v30, %v3221_v63  ;;  %v1611_v0 = vmax.f32 %v1503_v29, 0.0  ;;  %v1613_v36 = vmax.f32 %v1576_v17, 0.0 }
 0x3ad   : > { %v1505_v54 = vadd.f32 %v1504_v7, %v3222_v12  ;;  %v1578_v58 = vadd.f32 %v1577_v60, %v3222_v12  ;;  %v1506_v38 = vpop.f32.mrf.mxu0  ;;  %v1579_v61 = vpop.f32.mrf.mxu1  ;;  %v1679_v57 = vadd.f32 %v1639_v23, %v1635_v47  ;;  %v1705_v48 = vadd.f32 %v1641_v44, %v1637_v9 }
 0x3ae   : > { %v1507_v52 = vadd.f32 %v1506_v38, %v3222_v12  ;;  %v1580_v43 = vadd.f32 %v1579_v61, %v3222_v12  ;;  %v1643_v39 = vmul.f32 %v1611_v0, %v3221_v63  ;;  %v1645_v13 = vmul.f32 %v1613_v36, %v3221_v63  ;;  %v3227_v36 = vld [vmem:[#allocation20_spill] sm:$0xff] }
 0x3af   : > { %v1614_v55 = vmax.f32 %v1505_v54, 0.0  ;;  %v1616_v46 = vmax.f32 %v1578_v58, 0.0  ;;  %v1510_v28 = vpop.f32.mrf.mxu0  ;;  %v1583_v20 = vpop.f32.mrf.mxu1  ;;  %v1667_v4 = vadd.f32 %v1666_v19, %v1642_v49  ;;  %v1693_v34 = vadd.f32 %v1692_v1, %v1644_v37 }
 0x3b0   : > { %v1615_v35 = vmax.f32 %v1507_v52, 0.0  ;;  %v1617_v50 = vmax.f32 %v1580_v43, 0.0  ;;  %v1511_v59 = vadd.f32 %v1510_v28, %v3223_v27  ;;  %v1584_v6 = vadd.f32 %v1583_v20, %v3223_v27  ;;  %v3228_v43 = vld [vmem:[#allocation21_spill] sm:$0xff] }
 0x3b1   : > { %v1512_v2 = vpop.f32.mrf.mxu0  ;;  %v1585_v31 = vpop.f32.mrf.mxu1  ;;  %v1646_v3 = vmul.f32 %v1614_v55, %v3224_v14  ;;  %v1648_v51 = vmul.f32 %v1616_v46, %v3224_v14  ;;  %v1680_v21 = vadd.f32 %v1679_v57, %v1643_v39  ;;  %v1706_v26 = vadd.f32 %v1705_v48, %v1645_v13  ;;  %v3229_v48 = vld [vmem:[#allocation25_spill] sm:$0xff] }
 0x3b2   : > { %v1618_v25 = vmax.f32 %v1511_v59, 0.0  ;;  %v1620_v45 = vmax.f32 %v1584_v6, 0.0  ;;  %v1513_v56 = vadd.f32 %v1512_v2, %v3223_v27  ;;  %v1586_v8 = vadd.f32 %v1585_v31, %v3223_v27 }
 0x3b3   : > { %v1514_v40 = vpop.f32.mrf.mxu0  ;;  %v1587_v53 = vpop.f32.mrf.mxu1  ;;  %v1647_v42 = vmul.f32 %v1615_v35, %v3224_v14  ;;  %v1649_v62 = vmul.f32 %v1617_v50, %v3224_v14  ;;  %v1668_v47 = vadd.f32 %v1667_v4, %v1646_v3  ;;  %v1694_v9 = vadd.f32 %v1693_v34, %v1648_v51  ;;  %v3230_v14 = vld [vmem:[#allocation13_spill] sm:$0xff] }
 0x3b4   : > { %v1650_v5 = vmul.f32 %v1618_v25, %v3225_v11  ;;  %v1652_v10 = vmul.f32 %v1620_v45, %v3225_v11  ;;  %v1619_v22 = vmax.f32 %v1513_v56, 0.0  ;;  %v1621_v16 = vmax.f32 %v1586_v8, 0.0 }
 0x3b5   : > { %v1515_v24 = vadd.f32 %v1514_v40, %v3226_v15  ;;  %v1588_v41 = vadd.f32 %v1587_v53, %v3226_v15  ;;  %v1516_v18 = vpop.f32.mrf.mxu0  ;;  %v1589_v30 = vpop.f32.mrf.mxu1  ;;  %v1681_v58 = vadd.f32 %v1680_v21, %v1647_v42  ;;  %v1707_v38 = vadd.f32 %v1706_v26, %v1649_v62 }
 0x3b6   : > { %v1517_v29 = vadd.f32 %v1516_v18, %v3226_v15  ;;  %v1590_v17 = vadd.f32 %v1589_v30, %v3226_v15  ;;  %v1651_v7 = vmul.f32 %v1619_v22, %v3225_v11  ;;  %v1653_v60 = vmul.f32 %v1621_v16, %v3225_v11 }
 0x3b7   : > { %v1622_v23 = vmax.f32 %v1515_v24, 0.0  ;;  %v1624_v44 = vmax.f32 %v1588_v41, 0.0  ;;  %v1520_v63 = vpop.f32.mrf.mxu0  ;;  %v1593_v49 = vpop.f32.mrf.mxu1  ;;  %v1669_v61 = vadd.f32 %v1668_v47, %v1650_v5  ;;  %v1695_v19 = vadd.f32 %v1694_v9, %v1652_v10  ;;  %v3231_v24 = vld [vmem:[#allocation26_spill] sm:$0xff] }
 0x3b8   : > { %v1623_v37 = vmax.f32 %v1517_v29, 0.0  ;;  %v1625_v0 = vmax.f32 %v1590_v17, 0.0  ;;  %v1521_v12 = vadd.f32 %v1520_v63, %v3227_v36  ;;  %v1594_v54 = vadd.f32 %v1593_v49, %v3227_v36 }
 0x3b9   : > { %v1522_v1 = vpop.f32.mrf.mxu0  ;;  %v1595_v52 = vpop.f32.mrf.mxu1  ;;  %v1654_v39 = vmul.f32 %v1622_v23, %v3228_v43  ;;  %v1656_v13 = vmul.f32 %v1624_v44, %v3228_v43  ;;  %v1682_v28 = vadd.f32 %v1681_v58, %v1651_v7  ;;  %v1708_v20 = vadd.f32 %v1707_v38, %v1653_v60 }
 0x3ba   : > { %v1626_v55 = vmax.f32 %v1521_v12, 0.0  ;;  %v1628_v46 = vmax.f32 %v1594_v54, 0.0  ;;  %v1523_v35 = vadd.f32 %v1522_v1, %v3227_v36  ;;  %v1596_v50 = vadd.f32 %v1595_v52, %v3227_v36 }
 0x3bb   : > { %v1524_v27 = vpop.f32.mrf.mxu0  ;;  %v1597_v59 = vpop.f32.mrf.mxu1  ;;  %v1655_v6 = vmul.f32 %v1623_v37, %v3228_v43  ;;  %v1657_v57 = vmul.f32 %v1625_v0, %v3228_v43  ;;  %v1670_v21 = vadd.f32 %v1669_v61, %v1654_v39  ;;  %v1696_v26 = vadd.f32 %v1695_v19, %v1656_v13 }
 0x3bc   : > { %v1658_v4 = vmul.f32 %v1626_v55, %v3229_v48  ;;  %v1660_v34 = vmul.f32 %v1628_v46, %v3229_v48  ;;  %v1627_v2 = vmax.f32 %v1523_v35, 0.0  ;;  %v1629_v31 = vmax.f32 %v1596_v50, 0.0 }
 0x3bd   : > { %v1525_v3 = vadd.f32 %v1524_v27, %v3230_v14  ;;  %v1598_v51 = vadd.f32 %v1597_v59, %v3230_v14  ;;  %v1526_v25 = vpop.f32.mrf.mxu0  ;;  %v1599_v45 = vpop.f32.mrf.mxu1  ;;  %v1683_v11 = vadd.f32 %v1682_v28, %v1655_v6  ;;  %v1709_v5 = vadd.f32 %v1708_v20, %v1657_v57  ;;  %v3232_v59 = vld [vmem:[#allocation27_spill] sm:$0xff] }
 0x3be   : > { %v1527_v56 = vadd.f32 %v1526_v25, %v3230_v14  ;;  %v1600_v8 = vadd.f32 %v1599_v45, %v3230_v14  ;;  %v1659_v40 = vmul.f32 %v1627_v2, %v3229_v48  ;;  %v1661_v53 = vmul.f32 %v1629_v31, %v3229_v48 }
 0x3bf   : > { %v1630_v42 = vmax.f32 %v1525_v3, 0.0  ;;  %v1632_v62 = vmax.f32 %v1598_v51, 0.0  ;;  %v1671_v16 = vadd.f32 %v1670_v21, %v1658_v4  ;;  %v1697_v15 = vadd.f32 %v1696_v26, %v1660_v34 }
 0x3c0   : > { %v1631_v10 = vmax.f32 %v1527_v56, 0.0  ;;  %v1633_v22 = vmax.f32 %v1600_v8, 0.0  ;;  %v1684_v30 = vadd.f32 %v1683_v11, %v1659_v40  ;;  %v1710_v47 = vadd.f32 %v1709_v5, %v1661_v53 }
 0x3c1   : > { %v1662_v41 = vmul.f32 %v1630_v42, %v3231_v24  ;;  %v1664_v18 = vmul.f32 %v1632_v62, %v3231_v24 }
 0x3c2   : > { %v1663_v9 = vmul.f32 %v1631_v10, %v3231_v24  ;;  %v1665_v29 = vmul.f32 %v1633_v22, %v3231_v24 }
 0x3c3   : > { %v1672_v17 = vadd.f32 %v1671_v16, %v1662_v41  ;;  %v1698_v7 = vadd.f32 %v1697_v15, %v1664_v18 }
 0x3c4   : > { %v1685_v60 = vadd.f32 %v1684_v30, %v1663_v9  ;;  %v1711_v23 = vadd.f32 %v1710_v47, %v1665_v29 }
 0x3c5   : > { %v1673_v44 = vrot.slane %v1672_v17, 4  ;;  %v1699_v63 = vrot.slane %v1698_v7, 4 }
 0x3c6   : > { %v1686_v49 = vrot.slane %v1685_v60, 4  ;;  %v1712_v37 = vrot.slane %v1711_v23, 4 }
 0x3c7   : > { %v1674_v0 = vadd.f32 %v1673_v44, %v1672_v17  ;;  %v1700_v36 = vadd.f32 %v1699_v63, %v1698_v7 }
 0x3c8   : > { %v1687_v12 = vadd.f32 %v1686_v49, %v1685_v60  ;;  %v1713_v54 = vadd.f32 %v1712_v37, %v1711_v23 }
 0x3c9   : > { %v1675_v58 = vrot.slane %v1674_v0, 2  ;;  %v1701_v38 = vrot.slane %v1700_v36, 2 }
 0x3ca   : > { %v1688_v61 = vrot.slane %v1687_v12, 2  ;;  %v1714_v19 = vrot.slane %v1713_v54, 2 }
 0x3cb   : > { %v1676_v1 = vadd.f32 %v1675_v58, %v1674_v0  ;;  %v1702_v52 = vadd.f32 %v1701_v38, %v1700_v36 }
 0x3cc   : > { %v1689_v43 = vadd.f32 %v1688_v61, %v1687_v12  ;;  %v1715_v39 = vadd.f32 %v1714_v19, %v1713_v54 }
 0x3cd   : > { %v1677_v13 = vrot.slane %v1676_v1, 1  ;;  %v1703_v55 = vrot.slane %v1702_v52, 1 }
 0x3ce   : > { %v1690_v46 = vrot.slane %v1689_v43, 1  ;;  %v1716_v28 = vrot.slane %v1715_v39, 1 }
 0x3cf   : > { %v1678_v20 = vadd.f32 %v1677_v13, %v1676_v1  ;;  %v1704_v35 = vadd.f32 %v1703_v55, %v1702_v52 }
 0x3d0   : > { %v1691_v50 = vadd.f32 %v1690_v46, %v1689_v43  ;;  %v1717_v27 = vadd.f32 %v1716_v28, %v1715_v39 }
 0x3d1   : > { %v1718_v6 = vadd.f32 %v1678_v20, %v3232_v59  ;;  %v1720_v57 = vadd.f32 %v1704_v35, %v3232_v59 }
 0x3d2   : > { %v1719_v48 = vadd.f32 %v1691_v50, %v3232_v59  ;;  %v1721_v4 = vadd.f32 %v1717_v27, %v3232_v59 }
 0x3d4   : > { %v1726_v34 = vcombine.low %v1718_v6, %v1719_v48  ;;  %v1727_v2 = vcombine.low %v1720_v57, %v1721_v4 }
 0x3d6   : > { %v1734_v31 = vrot.slane %v1726_v34, %v2884_v32  ;;  %v1741_v14 = vrot.slane %v1727_v2, %v2884_v32 }
 0x3d8   : > { %v1742_v3 = vcombine.low %v1734_v31, %v1741_v14 }
 0x3da   : > { %v1749_v51 = vrot.slane %v1742_v3, %v2884_v32 }
 0x3dc   : > { %1885 = vst.msk [vmem:[%s2951_s11 + $0x4] sm:$0xf] %vm2889_vm1, %v1749_v51 }
 0x3dd   : > { %2019 = shalt.err (!%p2016_p0)
}
 0x3de   : > { %s2020_s26 = scalar_lea.hbm %s1766_s16, 128  ;;  %s2024_s7 = scalar_lea.hbm %s3115_s5, 512 }
 0x3df   : > { %p2021_p1 = scmp.ne.s32.totalorder %s1766_s16, %s2020_s26  ;;  %p2025_p4 = scmp.lt.s32.totalorder %s1766_s16, %s3115_s5 }
 0x3e0   : > { %p2026_p7 = scmp.lt.s32.totalorder %s2024_s7, %s2020_s26 }
 0x3e1   : > { %p2022_p2 = pnand %p2021_p1, %p2153_p5 }
 0x3e2   : > { %p2027_p6 = por %p2026_p7, %p2025_p4 }
 0x3e3   : > { %p2023_p3 = pneg %p2022_p2 }
 0x3e5   : > { %p2028_p8 = pnand %p2027_p6, %p2023_p3 }
 0x3e7   : > { %2031 = shalt.err (!%p2028_p8)
}
 0x3e8   : > { %1896 = dma.vmem_to_hbm [thread:$0]  (%p2153_p5), %s1769_s13, 128, %s1766_s16, %s1754_s17  }
 0x3e9 PF: > { %p1908_p9 = scmp.ge.s32.totalorder %s2070_s23, 2  ;;  %s1780_s10 = sand.u32 1, %s2058_s20  }
 0x3ea   : > { %p3233_p10 = scmp.ne.s32.totalorder %s3165_s30, 0  ;;  %s1781_s11 = scalar_lea.sflag [#allocation5], %s1780_s10 }
 0x3ec   : > { %p1903_p11 = pnand %p1908_p9, %p3233_p10 }
 0x3ee   : > { %p1904_p12 = pneg %p1903_p11 }
 0x3f0   : > { %2053 = dma.done.wait (%p1904_p12), %s1781_s11, 128  }
 0x3f1   : > { %2055 = vsyncadd (%p1904_p12), %s1781_s11, 4294967168  ;;  %p17_p13 = scmp.ge.s32.totalorder %s2140_s25, 6   ;;  %s3234_s20 = smov %s2062_s21 }
 0x3f2   : > { %s3235_s21 = smov %s2066_s22  ;;  %s3236_s22 = smov %s2151_s28 }
 0x3f3   : > { %s3237_s23 = smov %s2140_s25  ;;  %19 = sbr.rel (!%p17_p13) target bundleno = 6 (0x6), region = 82 }
 0x3f8   :  { %1786 = vsyncpa [#allocation4], 1 }
 0x3f9   :  { %1788 = vsyncpa [#allocation4 + $0x1], 1 }
 0x3fa   :  { %1789 = vsyncpa [#allocation5], 1 }
 0x3fb   :  { %1791 = vsyncpa [#allocation5 + $0x1], 1 }

</bundles_post_ra>
